<compile_context>
chip_gen: v7x
topology: tpu7x:2x2x1
jax: 0.10.0
libtpu: 0.0.40
codegen_flags: <defaults>
</compile_context>

<pallas_src>
import jax
import jax.numpy as jnp
from jax.experimental import pallas as pl
from jax.experimental.pallas import tpu as pltpu

EPS = 1e-5
HIDDEN = 128
INPUT_SIZE = 32
BATCH = 8
NUM_MID = 10           # layers 2..11
NUM_BN = 11
NUM_CLASSES = 2
OUT_PAD = 128          # lane-dense padded head width (== HIDDEN)


def residual_classifier_kernel(x_ref, w1_ref, wstack_ref, gb_ref, b12_ref, out_ref):
    def bn_affine(z, gb):
        # Training-mode BatchNorm1d, gamma folded into the rsqrt scale.
        gamma = gb[0:1, :]                                    # (1, H)
        beta = gb[1:2, :]                                     # (1, H)
        mean = jnp.mean(z, axis=0, keepdims=True)             # (1, H) sublane reduce
        c = z - mean                                          # centered (tighter numerics)
        var = jnp.mean(c * c, axis=0, keepdims=True)          # biased variance
        scale = gamma * jax.lax.rsqrt(var + EPS)              # EUP rsqrt (free slot)
        return c * scale + beta                               # one mul + one add

    x = x_ref[...]

    # layer1 -> bn1 -> relu  (bias omitted: cancelled by BN mean subtraction)
    h = jnp.dot(x, w1_ref[...], preferred_element_type=jnp.float32)
    h = jnp.maximum(bn_affine(h, gb_ref[0]), 0.0)

    # layers 2..11 with residual:  h = relu(bn_i(W_i h) + h)   (biases cancelled)
    for i in range(NUM_MID):   # static unroll; all weights resident in VMEM
        z = jnp.dot(h, wstack_ref[i], preferred_element_type=jnp.float32)
        z = bn_affine(z, gb_ref[i + 1])
        h = jnp.maximum(z + h, 0.0)

    # layer12 (no BN/ReLU) — padded to 128 output lanes for a lane-dense store.
    out = jnp.dot(h, wstack_ref[NUM_MID], preferred_element_type=jnp.float32)
    out_ref[...] = out + b12_ref[...]


@jax.jit
def residual_classifier(x, w1, wstack, gb, b12p):
    B = x.shape[0]
    vmem = pl.BlockSpec(memory_space=pltpu.MemorySpace.VMEM)  # whole array in VMEM
    out = pl.pallas_call(
        residual_classifier_kernel,
        out_shape=jax.ShapeDtypeStruct((B, OUT_PAD), jnp.float32),
        in_specs=[vmem] * 5,
        out_specs=vmem,
    )(x, w1, wstack, gb, b12p)
    return out[:, :NUM_CLASSES]


def init_params(key, input_size=INPUT_SIZE, hidden=HIDDEN):
    """Deterministic PyTorch-style (uniform +/- 1/sqrt(fan_in)) initialization."""
    def linear(k, fan_in, fan_out):
        kw, kb = jax.random.split(k)
        bound = 1.0 / (fan_in ** 0.5)
        w = jax.random.uniform(kw, (fan_in, fan_out), jnp.float32, -bound, bound)
        b = jax.random.uniform(kb, (fan_out,), jnp.float32, -bound, bound)
        return w, b

    keys = jax.random.split(key, 14)
    w1, b1 = linear(keys[0], input_size, hidden)
    mids = [linear(keys[1 + i], hidden, hidden) for i in range(NUM_MID)]
    wmid = jnp.stack([w for w, _ in mids])            # (10, H, H)
    bmid = jnp.stack([b for _, b in mids])            # (10, H)
    w12, b12 = linear(keys[11], hidden, NUM_CLASSES)

    # BN affine params (perturbed from default 1/0 so the check is non-trivial).
    gamma = 1.0 + 0.1 * jax.random.normal(keys[12], (NUM_BN, hidden), jnp.float32)
    beta = 0.1 * jax.random.normal(keys[13], (NUM_BN, hidden), jnp.float32)

    return dict(w1=w1, b1=b1, wmid=wmid, bmid=bmid,
                gamma=gamma, beta=beta, w12=w12, b12=b12)


def pack_kernel_params(p):
    """Pack PyTorch-fidelity params into the reduced kernel inputs."""
    hidden = p["w1"].shape[1]
    gb = jnp.stack([p["gamma"], p["beta"]], axis=1)                 # (11, 2, H)
    w12p = jnp.zeros((hidden, OUT_PAD), jnp.float32)
    w12p = w12p.at[:, :NUM_CLASSES].set(p["w12"])                   # (H, 128)
    wstack = jnp.concatenate([p["wmid"], w12p[None]], axis=0)       # (11, H, 128)
    b12p = jnp.zeros((1, OUT_PAD), jnp.float32)
    b12p = b12p.at[:, :NUM_CLASSES].set(p["b12"].reshape(1, -1))    # (1, 128)
    # b1 / bmid are intentionally NOT passed: a bias before training-mode BN is
    # exactly cancelled by the mean subtraction.
    return p["w1"], wstack, gb, b12p


def reference_forward(x, p):
    """Pure-JAX reference mirroring the PyTorch forward exactly (with biases)."""
    def bn(h, g, bta):
        mean = jnp.mean(h, axis=0, keepdims=True)
        var = jnp.mean((h - mean) ** 2, axis=0, keepdims=True)
        return (h - mean) / jnp.sqrt(var + EPS) * g + bta

    h = jnp.maximum(bn(x @ p["w1"] + p["b1"], p["gamma"][0], p["beta"][0]), 0.0)
    for i in range(NUM_MID):
        z = bn(h @ p["wmid"][i] + p["bmid"][i], p["gamma"][i + 1], p["beta"][i + 1])
        h = jnp.maximum(z + h, 0.0)
    return h @ p["w12"] + p["b12"]


if __name__ == "__main__":
    key = jax.random.PRNGKey(0)
    k_x, k_p = jax.random.split(key)
    x = jax.random.normal(k_x, (BATCH, INPUT_SIZE), jnp.float32)
    params = init_params(k_p)
    kparams = pack_kernel_params(params)

    out = residual_classifier(x, *kparams)
    out = jax.block_until_ready(out)

    ref = reference_forward(x, params)
    assert out.shape == (BATCH, NUM_CLASSES)
    assert jnp.allclose(out, ref, atol=1e-4, rtol=1e-4), (
        f"max abs err {jnp.max(jnp.abs(out - ref))}")

    print("KERNEL_OK")
</pallas_src>

<mosaic_0001>
module attributes {stable_mosaic.version = 11 : i64} {
  func.func @residual_classifier_kernel(%arg0: memref<8x32xf32, #tpu.memory_space<vmem>>, %arg1: memref<32x128xf32, #tpu.memory_space<vmem>>, %arg2: memref<11x128x128xf32, #tpu.memory_space<vmem>>, %arg3: memref<11x2x128xf32, #tpu.memory_space<vmem>>, %arg4: memref<1x128xf32, #tpu.memory_space<vmem>>, %arg5: memref<8x128xf32, #tpu.memory_space<vmem>>) attributes {dimension_semantics = [], scalar_prefetch = 0 : i64, scratch_operands = 0 : i64, tpu.core_type = #tpu.core_type<tc>} {
    %c0 = arith.constant 0 : index
    %c0_0 = arith.constant 0 : index
    %0 = vector.load %arg0[%c0, %c0_0] : memref<8x32xf32, #tpu.memory_space<vmem>>, vector<8x32xf32>
    %c0_1 = arith.constant 0 : index
    %c0_2 = arith.constant 0 : index
    %1 = vector.load %arg1[%c0_1, %c0_2] : memref<32x128xf32, #tpu.memory_space<vmem>>, vector<32x128xf32>
    %cst = arith.constant dense<0.000000e+00> : vector<8x128xf32>
    %2 = tpu.matmul %0, %1, %cst {dimension_numbers = #tpu.dot_dimension_numbers<[1], [0], [0], [1], [0, 0, 1, 1], [], []>} : vector<8x32xf32>, vector<32x128xf32>, vector<8x128xf32> -> vector<8x128xf32>
    %c0_3 = arith.constant 0 : index
    %c0_4 = arith.constant 0 : index
    %c0_5 = arith.constant 0 : index
    %3 = vector.load %arg3[%c0_3, %c0_4, %c0_5] : memref<11x2x128xf32, #tpu.memory_space<vmem>>, vector<1x2x128xf32>
    %4 = vector.shape_cast %3 : vector<1x2x128xf32> to vector<2x128xf32>
    %5 = vector.extract_strided_slice %4 {offsets = [0, 0], sizes = [1, 128], strides = [1, 1]} : vector<2x128xf32> to vector<1x128xf32>
    %6 = vector.extract_strided_slice %4 {offsets = [1, 0], sizes = [1, 128], strides = [1, 1]} : vector<2x128xf32> to vector<1x128xf32>
    %cst_6 = arith.constant dense<0.000000e+00> : vector<128xf32>
    %7 = vector.multi_reduction <add>, %2, %cst_6 [0] : vector<8x128xf32> to vector<128xf32>
    %8 = vector.shape_cast %7 : vector<128xf32> to vector<1x128xf32>
    %cst_7 = arith.constant 8.000000e+00 : f32
    %9 = vector.broadcast %cst_7 : f32 to vector<1x128xf32>
    %10 = arith.divf %8, %9 : vector<1x128xf32>
    %11 = vector.broadcast %10 : vector<1x128xf32> to vector<8x128xf32>
    %12 = arith.subf %2, %11 : vector<8x128xf32>
    %13 = arith.mulf %12, %12 : vector<8x128xf32>
    %cst_8 = arith.constant dense<0.000000e+00> : vector<128xf32>
    %14 = vector.multi_reduction <add>, %13, %cst_8 [0] : vector<8x128xf32> to vector<128xf32>
    %15 = vector.shape_cast %14 : vector<128xf32> to vector<1x128xf32>
    %cst_9 = arith.constant 8.000000e+00 : f32
    %16 = vector.broadcast %cst_9 : f32 to vector<1x128xf32>
    %17 = arith.divf %15, %16 : vector<1x128xf32>
    %cst_10 = arith.constant 9.99999974E-6 : f32
    %18 = vector.broadcast %cst_10 : f32 to vector<1x128xf32>
    %19 = arith.addf %17, %18 : vector<1x128xf32>
    %20 = math.rsqrt %19 : vector<1x128xf32>
    %21 = arith.mulf %5, %20 : vector<1x128xf32>
    %22 = vector.broadcast %21 : vector<1x128xf32> to vector<8x128xf32>
    %23 = arith.mulf %12, %22 : vector<8x128xf32>
    %24 = vector.broadcast %6 : vector<1x128xf32> to vector<8x128xf32>
    %25 = arith.addf %23, %24 : vector<8x128xf32>
    %cst_11 = arith.constant 0.000000e+00 : f32
    %26 = vector.broadcast %cst_11 : f32 to vector<8x128xf32>
    %27 = arith.maximumf %25, %26 : vector<8x128xf32>
    %c0_12 = arith.constant 0 : index
    %c0_13 = arith.constant 0 : index
    %c0_14 = arith.constant 0 : index
    %28 = vector.load %arg2[%c0_12, %c0_13, %c0_14] : memref<11x128x128xf32, #tpu.memory_space<vmem>>, vector<1x128x128xf32>
    %29 = vector.shape_cast %28 : vector<1x128x128xf32> to vector<128x128xf32>
    %cst_15 = arith.constant dense<0.000000e+00> : vector<8x128xf32>
    %30 = tpu.matmul %27, %29, %cst_15 {dimension_numbers = #tpu.dot_dimension_numbers<[1], [0], [0], [1], [0, 0, 1, 1], [], []>} : vector<8x128xf32>, vector<128x128xf32>, vector<8x128xf32> -> vector<8x128xf32>
    %c1 = arith.constant 1 : index
    %c0_16 = arith.constant 0 : index
    %c0_17 = arith.constant 0 : index
    %31 = vector.load %arg3[%c1, %c0_16, %c0_17] : memref<11x2x128xf32, #tpu.memory_space<vmem>>, vector<1x2x128xf32>
    %32 = vector.shape_cast %31 : vector<1x2x128xf32> to vector<2x128xf32>
    %33 = vector.extract_strided_slice %32 {offsets = [0, 0], sizes = [1, 128], strides = [1, 1]} : vector<2x128xf32> to vector<1x128xf32>
    %34 = vector.extract_strided_slice %32 {offsets = [1, 0], sizes = [1, 128], strides = [1, 1]} : vector<2x128xf32> to vector<1x128xf32>
    %cst_18 = arith.constant dense<0.000000e+00> : vector<128xf32>
    %35 = vector.multi_reduction <add>, %30, %cst_18 [0] : vector<8x128xf32> to vector<128xf32>
    %36 = vector.shape_cast %35 : vector<128xf32> to vector<1x128xf32>
    %cst_19 = arith.constant 8.000000e+00 : f32
    %37 = vector.broadcast %cst_19 : f32 to vector<1x128xf32>
    %38 = arith.divf %36, %37 : vector<1x128xf32>
    %39 = vector.broadcast %38 : vector<1x128xf32> to vector<8x128xf32>
    %40 = arith.subf %30, %39 : vector<8x128xf32>
    %41 = arith.mulf %40, %40 : vector<8x128xf32>
    %cst_20 = arith.constant dense<0.000000e+00> : vector<128xf32>
    %42 = vector.multi_reduction <add>, %41, %cst_20 [0] : vector<8x128xf32> to vector<128xf32>
    %43 = vector.shape_cast %42 : vector<128xf32> to vector<1x128xf32>
    %cst_21 = arith.constant 8.000000e+00 : f32
    %44 = vector.broadcast %cst_21 : f32 to vector<1x128xf32>
    %45 = arith.divf %43, %44 : vector<1x128xf32>
    %cst_22 = arith.constant 9.99999974E-6 : f32
    %46 = vector.broadcast %cst_22 : f32 to vector<1x128xf32>
    %47 = arith.addf %45, %46 : vector<1x128xf32>
    %48 = math.rsqrt %47 : vector<1x128xf32>
    %49 = arith.mulf %33, %48 : vector<1x128xf32>
    %50 = vector.broadcast %49 : vector<1x128xf32> to vector<8x128xf32>
    %51 = arith.mulf %40, %50 : vector<8x128xf32>
    %52 = vector.broadcast %34 : vector<1x128xf32> to vector<8x128xf32>
    %53 = arith.addf %51, %52 : vector<8x128xf32>
    %54 = arith.addf %53, %27 : vector<8x128xf32>
    %cst_23 = arith.constant 0.000000e+00 : f32
    %55 = vector.broadcast %cst_23 : f32 to vector<8x128xf32>
    %56 = arith.maximumf %54, %55 : vector<8x128xf32>
    %c1_24 = arith.constant 1 : index
    %c0_25 = arith.constant 0 : index
    %c0_26 = arith.constant 0 : index
    %57 = vector.load %arg2[%c1_24, %c0_25, %c0_26] : memref<11x128x128xf32, #tpu.memory_space<vmem>>, vector<1x128x128xf32>
    %58 = vector.shape_cast %57 : vector<1x128x128xf32> to vector<128x128xf32>
    %cst_27 = arith.constant dense<0.000000e+00> : vector<8x128xf32>
    %59 = tpu.matmul %56, %58, %cst_27 {dimension_numbers = #tpu.dot_dimension_numbers<[1], [0], [0], [1], [0, 0, 1, 1], [], []>} : vector<8x128xf32>, vector<128x128xf32>, vector<8x128xf32> -> vector<8x128xf32>
    %c2 = arith.constant 2 : index
    %c0_28 = arith.constant 0 : index
    %c0_29 = arith.constant 0 : index
    %60 = vector.load %arg3[%c2, %c0_28, %c0_29] : memref<11x2x128xf32, #tpu.memory_space<vmem>>, vector<1x2x128xf32>
    %61 = vector.shape_cast %60 : vector<1x2x128xf32> to vector<2x128xf32>
    %62 = vector.extract_strided_slice %61 {offsets = [0, 0], sizes = [1, 128], strides = [1, 1]} : vector<2x128xf32> to vector<1x128xf32>
    %63 = vector.extract_strided_slice %61 {offsets = [1, 0], sizes = [1, 128], strides = [1, 1]} : vector<2x128xf32> to vector<1x128xf32>
    %cst_30 = arith.constant dense<0.000000e+00> : vector<128xf32>
    %64 = vector.multi_reduction <add>, %59, %cst_30 [0] : vector<8x128xf32> to vector<128xf32>
    %65 = vector.shape_cast %64 : vector<128xf32> to vector<1x128xf32>
    %cst_31 = arith.constant 8.000000e+00 : f32
    %66 = vector.broadcast %cst_31 : f32 to vector<1x128xf32>
    %67 = arith.divf %65, %66 : vector<1x128xf32>
    %68 = vector.broadcast %67 : vector<1x128xf32> to vector<8x128xf32>
    %69 = arith.subf %59, %68 : vector<8x128xf32>
    %70 = arith.mulf %69, %69 : vector<8x128xf32>
    %cst_32 = arith.constant dense<0.000000e+00> : vector<128xf32>
    %71 = vector.multi_reduction <add>, %70, %cst_32 [0] : vector<8x128xf32> to vector<128xf32>
    %72 = vector.shape_cast %71 : vector<128xf32> to vector<1x128xf32>
    %cst_33 = arith.constant 8.000000e+00 : f32
    %73 = vector.broadcast %cst_33 : f32 to vector<1x128xf32>
    %74 = arith.divf %72, %73 : vector<1x128xf32>
    %cst_34 = arith.constant 9.99999974E-6 : f32
    %75 = vector.broadcast %cst_34 : f32 to vector<1x128xf32>
    %76 = arith.addf %74, %75 : vector<1x128xf32>
    %77 = math.rsqrt %76 : vector<1x128xf32>
    %78 = arith.mulf %62, %77 : vector<1x128xf32>
    %79 = vector.broadcast %78 : vector<1x128xf32> to vector<8x128xf32>
    %80 = arith.mulf %69, %79 : vector<8x128xf32>
    %81 = vector.broadcast %63 : vector<1x128xf32> to vector<8x128xf32>
    %82 = arith.addf %80, %81 : vector<8x128xf32>
    %83 = arith.addf %82, %56 : vector<8x128xf32>
    %cst_35 = arith.constant 0.000000e+00 : f32
    %84 = vector.broadcast %cst_35 : f32 to vector<8x128xf32>
    %85 = arith.maximumf %83, %84 : vector<8x128xf32>
    %c2_36 = arith.constant 2 : index
    %c0_37 = arith.constant 0 : index
    %c0_38 = arith.constant 0 : index
    %86 = vector.load %arg2[%c2_36, %c0_37, %c0_38] : memref<11x128x128xf32, #tpu.memory_space<vmem>>, vector<1x128x128xf32>
    %87 = vector.shape_cast %86 : vector<1x128x128xf32> to vector<128x128xf32>
    %cst_39 = arith.constant dense<0.000000e+00> : vector<8x128xf32>
    %88 = tpu.matmul %85, %87, %cst_39 {dimension_numbers = #tpu.dot_dimension_numbers<[1], [0], [0], [1], [0, 0, 1, 1], [], []>} : vector<8x128xf32>, vector<128x128xf32>, vector<8x128xf32> -> vector<8x128xf32>
    %c3 = arith.constant 3 : index
    %c0_40 = arith.constant 0 : index
    %c0_41 = arith.constant 0 : index
    %89 = vector.load %arg3[%c3, %c0_40, %c0_41] : memref<11x2x128xf32, #tpu.memory_space<vmem>>, vector<1x2x128xf32>
    %90 = vector.shape_cast %89 : vector<1x2x128xf32> to vector<2x128xf32>
    %91 = vector.extract_strided_slice %90 {offsets = [0, 0], sizes = [1, 128], strides = [1, 1]} : vector<2x128xf32> to vector<1x128xf32>
    %92 = vector.extract_strided_slice %90 {offsets = [1, 0], sizes = [1, 128], strides = [1, 1]} : vector<2x128xf32> to vector<1x128xf32>
    %cst_42 = arith.constant dense<0.000000e+00> : vector<128xf32>
    %93 = vector.multi_reduction <add>, %88, %cst_42 [0] : vector<8x128xf32> to vector<128xf32>
    %94 = vector.shape_cast %93 : vector<128xf32> to vector<1x128xf32>
    %cst_43 = arith.constant 8.000000e+00 : f32
    %95 = vector.broadcast %cst_43 : f32 to vector<1x128xf32>
    %96 = arith.divf %94, %95 : vector<1x128xf32>
    %97 = vector.broadcast %96 : vector<1x128xf32> to vector<8x128xf32>
    %98 = arith.subf %88, %97 : vector<8x128xf32>
    %99 = arith.mulf %98, %98 : vector<8x128xf32>
    %cst_44 = arith.constant dense<0.000000e+00> : vector<128xf32>
    %100 = vector.multi_reduction <add>, %99, %cst_44 [0] : vector<8x128xf32> to vector<128xf32>
    %101 = vector.shape_cast %100 : vector<128xf32> to vector<1x128xf32>
    %cst_45 = arith.constant 8.000000e+00 : f32
    %102 = vector.broadcast %cst_45 : f32 to vector<1x128xf32>
    %103 = arith.divf %101, %102 : vector<1x128xf32>
    %cst_46 = arith.constant 9.99999974E-6 : f32
    %104 = vector.broadcast %cst_46 : f32 to vector<1x128xf32>
    %105 = arith.addf %103, %104 : vector<1x128xf32>
    %106 = math.rsqrt %105 : vector<1x128xf32>
    %107 = arith.mulf %91, %106 : vector<1x128xf32>
    %108 = vector.broadcast %107 : vector<1x128xf32> to vector<8x128xf32>
    %109 = arith.mulf %98, %108 : vector<8x128xf32>
    %110 = vector.broadcast %92 : vector<1x128xf32> to vector<8x128xf32>
    %111 = arith.addf %109, %110 : vector<8x128xf32>
    %112 = arith.addf %111, %85 : vector<8x128xf32>
    %cst_47 = arith.constant 0.000000e+00 : f32
    %113 = vector.broadcast %cst_47 : f32 to vector<8x128xf32>
    %114 = arith.maximumf %112, %113 : vector<8x128xf32>
    %c3_48 = arith.constant 3 : index
    %c0_49 = arith.constant 0 : index
    %c0_50 = arith.constant 0 : index
    %115 = vector.load %arg2[%c3_48, %c0_49, %c0_50] : memref<11x128x128xf32, #tpu.memory_space<vmem>>, vector<1x128x128xf32>
    %116 = vector.shape_cast %115 : vector<1x128x128xf32> to vector<128x128xf32>
    %cst_51 = arith.constant dense<0.000000e+00> : vector<8x128xf32>
    %117 = tpu.matmul %114, %116, %cst_51 {dimension_numbers = #tpu.dot_dimension_numbers<[1], [0], [0], [1], [0, 0, 1, 1], [], []>} : vector<8x128xf32>, vector<128x128xf32>, vector<8x128xf32> -> vector<8x128xf32>
    %c4 = arith.constant 4 : index
    %c0_52 = arith.constant 0 : index
    %c0_53 = arith.constant 0 : index
    %118 = vector.load %arg3[%c4, %c0_52, %c0_53] : memref<11x2x128xf32, #tpu.memory_space<vmem>>, vector<1x2x128xf32>
    %119 = vector.shape_cast %118 : vector<1x2x128xf32> to vector<2x128xf32>
    %120 = vector.extract_strided_slice %119 {offsets = [0, 0], sizes = [1, 128], strides = [1, 1]} : vector<2x128xf32> to vector<1x128xf32>
    %121 = vector.extract_strided_slice %119 {offsets = [1, 0], sizes = [1, 128], strides = [1, 1]} : vector<2x128xf32> to vector<1x128xf32>
    %cst_54 = arith.constant dense<0.000000e+00> : vector<128xf32>
    %122 = vector.multi_reduction <add>, %117, %cst_54 [0] : vector<8x128xf32> to vector<128xf32>
    %123 = vector.shape_cast %122 : vector<128xf32> to vector<1x128xf32>
    %cst_55 = arith.constant 8.000000e+00 : f32
    %124 = vector.broadcast %cst_55 : f32 to vector<1x128xf32>
    %125 = arith.divf %123, %124 : vector<1x128xf32>
    %126 = vector.broadcast %125 : vector<1x128xf32> to vector<8x128xf32>
    %127 = arith.subf %117, %126 : vector<8x128xf32>
    %128 = arith.mulf %127, %127 : vector<8x128xf32>
    %cst_56 = arith.constant dense<0.000000e+00> : vector<128xf32>
    %129 = vector.multi_reduction <add>, %128, %cst_56 [0] : vector<8x128xf32> to vector<128xf32>
    %130 = vector.shape_cast %129 : vector<128xf32> to vector<1x128xf32>
    %cst_57 = arith.constant 8.000000e+00 : f32
    %131 = vector.broadcast %cst_57 : f32 to vector<1x128xf32>
    %132 = arith.divf %130, %131 : vector<1x128xf32>
    %cst_58 = arith.constant 9.99999974E-6 : f32
    %133 = vector.broadcast %cst_58 : f32 to vector<1x128xf32>
    %134 = arith.addf %132, %133 : vector<1x128xf32>
    %135 = math.rsqrt %134 : vector<1x128xf32>
    %136 = arith.mulf %120, %135 : vector<1x128xf32>
    %137 = vector.broadcast %136 : vector<1x128xf32> to vector<8x128xf32>
    %138 = arith.mulf %127, %137 : vector<8x128xf32>
    %139 = vector.broadcast %121 : vector<1x128xf32> to vector<8x128xf32>
    %140 = arith.addf %138, %139 : vector<8x128xf32>
    %141 = arith.addf %140, %114 : vector<8x128xf32>
    %cst_59 = arith.constant 0.000000e+00 : f32
    %142 = vector.broadcast %cst_59 : f32 to vector<8x128xf32>
    %143 = arith.maximumf %141, %142 : vector<8x128xf32>
    %c4_60 = arith.constant 4 : index
    %c0_61 = arith.constant 0 : index
    %c0_62 = arith.constant 0 : index
    %144 = vector.load %arg2[%c4_60, %c0_61, %c0_62] : memref<11x128x128xf32, #tpu.memory_space<vmem>>, vector<1x128x128xf32>
    %145 = vector.shape_cast %144 : vector<1x128x128xf32> to vector<128x128xf32>
    %cst_63 = arith.constant dense<0.000000e+00> : vector<8x128xf32>
    %146 = tpu.matmul %143, %145, %cst_63 {dimension_numbers = #tpu.dot_dimension_numbers<[1], [0], [0], [1], [0, 0, 1, 1], [], []>} : vector<8x128xf32>, vector<128x128xf32>, vector<8x128xf32> -> vector<8x128xf32>
    %c5 = arith.constant 5 : index
    %c0_64 = arith.constant 0 : index
    %c0_65 = arith.constant 0 : index
    %147 = vector.load %arg3[%c5, %c0_64, %c0_65] : memref<11x2x128xf32, #tpu.memory_space<vmem>>, vector<1x2x128xf32>
    %148 = vector.shape_cast %147 : vector<1x2x128xf32> to vector<2x128xf32>
    %149 = vector.extract_strided_slice %148 {offsets = [0, 0], sizes = [1, 128], strides = [1, 1]} : vector<2x128xf32> to vector<1x128xf32>
    %150 = vector.extract_strided_slice %148 {offsets = [1, 0], sizes = [1, 128], strides = [1, 1]} : vector<2x128xf32> to vector<1x128xf32>
    %cst_66 = arith.constant dense<0.000000e+00> : vector<128xf32>
    %151 = vector.multi_reduction <add>, %146, %cst_66 [0] : vector<8x128xf32> to vector<128xf32>
    %152 = vector.shape_cast %151 : vector<128xf32> to vector<1x128xf32>
    %cst_67 = arith.constant 8.000000e+00 : f32
    %153 = vector.broadcast %cst_67 : f32 to vector<1x128xf32>
    %154 = arith.divf %152, %153 : vector<1x128xf32>
    %155 = vector.broadcast %154 : vector<1x128xf32> to vector<8x128xf32>
    %156 = arith.subf %146, %155 : vector<8x128xf32>
    %157 = arith.mulf %156, %156 : vector<8x128xf32>
    %cst_68 = arith.constant dense<0.000000e+00> : vector<128xf32>
    %158 = vector.multi_reduction <add>, %157, %cst_68 [0] : vector<8x128xf32> to vector<128xf32>
    %159 = vector.shape_cast %158 : vector<128xf32> to vector<1x128xf32>
    %cst_69 = arith.constant 8.000000e+00 : f32
    %160 = vector.broadcast %cst_69 : f32 to vector<1x128xf32>
    %161 = arith.divf %159, %160 : vector<1x128xf32>
    %cst_70 = arith.constant 9.99999974E-6 : f32
    %162 = vector.broadcast %cst_70 : f32 to vector<1x128xf32>
    %163 = arith.addf %161, %162 : vector<1x128xf32>
    %164 = math.rsqrt %163 : vector<1x128xf32>
    %165 = arith.mulf %149, %164 : vector<1x128xf32>
    %166 = vector.broadcast %165 : vector<1x128xf32> to vector<8x128xf32>
    %167 = arith.mulf %156, %166 : vector<8x128xf32>
    %168 = vector.broadcast %150 : vector<1x128xf32> to vector<8x128xf32>
    %169 = arith.addf %167, %168 : vector<8x128xf32>
    %170 = arith.addf %169, %143 : vector<8x128xf32>
    %cst_71 = arith.constant 0.000000e+00 : f32
    %171 = vector.broadcast %cst_71 : f32 to vector<8x128xf32>
    %172 = arith.maximumf %170, %171 : vector<8x128xf32>
    %c5_72 = arith.constant 5 : index
    %c0_73 = arith.constant 0 : index
    %c0_74 = arith.constant 0 : index
    %173 = vector.load %arg2[%c5_72, %c0_73, %c0_74] : memref<11x128x128xf32, #tpu.memory_space<vmem>>, vector<1x128x128xf32>
    %174 = vector.shape_cast %173 : vector<1x128x128xf32> to vector<128x128xf32>
    %cst_75 = arith.constant dense<0.000000e+00> : vector<8x128xf32>
    %175 = tpu.matmul %172, %174, %cst_75 {dimension_numbers = #tpu.dot_dimension_numbers<[1], [0], [0], [1], [0, 0, 1, 1], [], []>} : vector<8x128xf32>, vector<128x128xf32>, vector<8x128xf32> -> vector<8x128xf32>
    %c6 = arith.constant 6 : index
    %c0_76 = arith.constant 0 : index
    %c0_77 = arith.constant 0 : index
    %176 = vector.load %arg3[%c6, %c0_76, %c0_77] : memref<11x2x128xf32, #tpu.memory_space<vmem>>, vector<1x2x128xf32>
    %177 = vector.shape_cast %176 : vector<1x2x128xf32> to vector<2x128xf32>
    %178 = vector.extract_strided_slice %177 {offsets = [0, 0], sizes = [1, 128], strides = [1, 1]} : vector<2x128xf32> to vector<1x128xf32>
    %179 = vector.extract_strided_slice %177 {offsets = [1, 0], sizes = [1, 128], strides = [1, 1]} : vector<2x128xf32> to vector<1x128xf32>
    %cst_78 = arith.constant dense<0.000000e+00> : vector<128xf32>
    %180 = vector.multi_reduction <add>, %175, %cst_78 [0] : vector<8x128xf32> to vector<128xf32>
    %181 = vector.shape_cast %180 : vector<128xf32> to vector<1x128xf32>
    %cst_79 = arith.constant 8.000000e+00 : f32
    %182 = vector.broadcast %cst_79 : f32 to vector<1x128xf32>
    %183 = arith.divf %181, %182 : vector<1x128xf32>
    %184 = vector.broadcast %183 : vector<1x128xf32> to vector<8x128xf32>
    %185 = arith.subf %175, %184 : vector<8x128xf32>
    %186 = arith.mulf %185, %185 : vector<8x128xf32>
    %cst_80 = arith.constant dense<0.000000e+00> : vector<128xf32>
    %187 = vector.multi_reduction <add>, %186, %cst_80 [0] : vector<8x128xf32> to vector<128xf32>
    %188 = vector.shape_cast %187 : vector<128xf32> to vector<1x128xf32>
    %cst_81 = arith.constant 8.000000e+00 : f32
    %189 = vector.broadcast %cst_81 : f32 to vector<1x128xf32>
    %190 = arith.divf %188, %189 : vector<1x128xf32>
    %cst_82 = arith.constant 9.99999974E-6 : f32
    %191 = vector.broadcast %cst_82 : f32 to vector<1x128xf32>
    %192 = arith.addf %190, %191 : vector<1x128xf32>
    %193 = math.rsqrt %192 : vector<1x128xf32>
    %194 = arith.mulf %178, %193 : vector<1x128xf32>
    %195 = vector.broadcast %194 : vector<1x128xf32> to vector<8x128xf32>
    %196 = arith.mulf %185, %195 : vector<8x128xf32>
    %197 = vector.broadcast %179 : vector<1x128xf32> to vector<8x128xf32>
    %198 = arith.addf %196, %197 : vector<8x128xf32>
    %199 = arith.addf %198, %172 : vector<8x128xf32>
    %cst_83 = arith.constant 0.000000e+00 : f32
    %200 = vector.broadcast %cst_83 : f32 to vector<8x128xf32>
    %201 = arith.maximumf %199, %200 : vector<8x128xf32>
    %c6_84 = arith.constant 6 : index
    %c0_85 = arith.constant 0 : index
    %c0_86 = arith.constant 0 : index
    %202 = vector.load %arg2[%c6_84, %c0_85, %c0_86] : memref<11x128x128xf32, #tpu.memory_space<vmem>>, vector<1x128x128xf32>
    %203 = vector.shape_cast %202 : vector<1x128x128xf32> to vector<128x128xf32>
    %cst_87 = arith.constant dense<0.000000e+00> : vector<8x128xf32>
    %204 = tpu.matmul %201, %203, %cst_87 {dimension_numbers = #tpu.dot_dimension_numbers<[1], [0], [0], [1], [0, 0, 1, 1], [], []>} : vector<8x128xf32>, vector<128x128xf32>, vector<8x128xf32> -> vector<8x128xf32>
    %c7 = arith.constant 7 : index
    %c0_88 = arith.constant 0 : index
    %c0_89 = arith.constant 0 : index
    %205 = vector.load %arg3[%c7, %c0_88, %c0_89] : memref<11x2x128xf32, #tpu.memory_space<vmem>>, vector<1x2x128xf32>
    %206 = vector.shape_cast %205 : vector<1x2x128xf32> to vector<2x128xf32>
    %207 = vector.extract_strided_slice %206 {offsets = [0, 0], sizes = [1, 128], strides = [1, 1]} : vector<2x128xf32> to vector<1x128xf32>
    %208 = vector.extract_strided_slice %206 {offsets = [1, 0], sizes = [1, 128], strides = [1, 1]} : vector<2x128xf32> to vector<1x128xf32>
    %cst_90 = arith.constant dense<0.000000e+00> : vector<128xf32>
    %209 = vector.multi_reduction <add>, %204, %cst_90 [0] : vector<8x128xf32> to vector<128xf32>
    %210 = vector.shape_cast %209 : vector<128xf32> to vector<1x128xf32>
    %cst_91 = arith.constant 8.000000e+00 : f32
    %211 = vector.broadcast %cst_91 : f32 to vector<1x128xf32>
    %212 = arith.divf %210, %211 : vector<1x128xf32>
    %213 = vector.broadcast %212 : vector<1x128xf32> to vector<8x128xf32>
    %214 = arith.subf %204, %213 : vector<8x128xf32>
    %215 = arith.mulf %214, %214 : vector<8x128xf32>
    %cst_92 = arith.constant dense<0.000000e+00> : vector<128xf32>
    %216 = vector.multi_reduction <add>, %215, %cst_92 [0] : vector<8x128xf32> to vector<128xf32>
    %217 = vector.shape_cast %216 : vector<128xf32> to vector<1x128xf32>
    %cst_93 = arith.constant 8.000000e+00 : f32
    %218 = vector.broadcast %cst_93 : f32 to vector<1x128xf32>
    %219 = arith.divf %217, %218 : vector<1x128xf32>
    %cst_94 = arith.constant 9.99999974E-6 : f32
    %220 = vector.broadcast %cst_94 : f32 to vector<1x128xf32>
    %221 = arith.addf %219, %220 : vector<1x128xf32>
    %222 = math.rsqrt %221 : vector<1x128xf32>
    %223 = arith.mulf %207, %222 : vector<1x128xf32>
    %224 = vector.broadcast %223 : vector<1x128xf32> to vector<8x128xf32>
    %225 = arith.mulf %214, %224 : vector<8x128xf32>
    %226 = vector.broadcast %208 : vector<1x128xf32> to vector<8x128xf32>
    %227 = arith.addf %225, %226 : vector<8x128xf32>
    %228 = arith.addf %227, %201 : vector<8x128xf32>
    %cst_95 = arith.constant 0.000000e+00 : f32
    %229 = vector.broadcast %cst_95 : f32 to vector<8x128xf32>
    %230 = arith.maximumf %228, %229 : vector<8x128xf32>
    %c7_96 = arith.constant 7 : index
    %c0_97 = arith.constant 0 : index
    %c0_98 = arith.constant 0 : index
    %231 = vector.load %arg2[%c7_96, %c0_97, %c0_98] : memref<11x128x128xf32, #tpu.memory_space<vmem>>, vector<1x128x128xf32>
    %232 = vector.shape_cast %231 : vector<1x128x128xf32> to vector<128x128xf32>
    %cst_99 = arith.constant dense<0.000000e+00> : vector<8x128xf32>
    %233 = tpu.matmul %230, %232, %cst_99 {dimension_numbers = #tpu.dot_dimension_numbers<[1], [0], [0], [1], [0, 0, 1, 1], [], []>} : vector<8x128xf32>, vector<128x128xf32>, vector<8x128xf32> -> vector<8x128xf32>
    %c8 = arith.constant 8 : index
    %c0_100 = arith.constant 0 : index
    %c0_101 = arith.constant 0 : index
    %234 = vector.load %arg3[%c8, %c0_100, %c0_101] : memref<11x2x128xf32, #tpu.memory_space<vmem>>, vector<1x2x128xf32>
    %235 = vector.shape_cast %234 : vector<1x2x128xf32> to vector<2x128xf32>
    %236 = vector.extract_strided_slice %235 {offsets = [0, 0], sizes = [1, 128], strides = [1, 1]} : vector<2x128xf32> to vector<1x128xf32>
    %237 = vector.extract_strided_slice %235 {offsets = [1, 0], sizes = [1, 128], strides = [1, 1]} : vector<2x128xf32> to vector<1x128xf32>
    %cst_102 = arith.constant dense<0.000000e+00> : vector<128xf32>
    %238 = vector.multi_reduction <add>, %233, %cst_102 [0] : vector<8x128xf32> to vector<128xf32>
    %239 = vector.shape_cast %238 : vector<128xf32> to vector<1x128xf32>
    %cst_103 = arith.constant 8.000000e+00 : f32
    %240 = vector.broadcast %cst_103 : f32 to vector<1x128xf32>
    %241 = arith.divf %239, %240 : vector<1x128xf32>
    %242 = vector.broadcast %241 : vector<1x128xf32> to vector<8x128xf32>
    %243 = arith.subf %233, %242 : vector<8x128xf32>
    %244 = arith.mulf %243, %243 : vector<8x128xf32>
    %cst_104 = arith.constant dense<0.000000e+00> : vector<128xf32>
    %245 = vector.multi_reduction <add>, %244, %cst_104 [0] : vector<8x128xf32> to vector<128xf32>
    %246 = vector.shape_cast %245 : vector<128xf32> to vector<1x128xf32>
    %cst_105 = arith.constant 8.000000e+00 : f32
    %247 = vector.broadcast %cst_105 : f32 to vector<1x128xf32>
    %248 = arith.divf %246, %247 : vector<1x128xf32>
    %cst_106 = arith.constant 9.99999974E-6 : f32
    %249 = vector.broadcast %cst_106 : f32 to vector<1x128xf32>
    %250 = arith.addf %248, %249 : vector<1x128xf32>
    %251 = math.rsqrt %250 : vector<1x128xf32>
    %252 = arith.mulf %236, %251 : vector<1x128xf32>
    %253 = vector.broadcast %252 : vector<1x128xf32> to vector<8x128xf32>
    %254 = arith.mulf %243, %253 : vector<8x128xf32>
    %255 = vector.broadcast %237 : vector<1x128xf32> to vector<8x128xf32>
    %256 = arith.addf %254, %255 : vector<8x128xf32>
    %257 = arith.addf %256, %230 : vector<8x128xf32>
    %cst_107 = arith.constant 0.000000e+00 : f32
    %258 = vector.broadcast %cst_107 : f32 to vector<8x128xf32>
    %259 = arith.maximumf %257, %258 : vector<8x128xf32>
    %c8_108 = arith.constant 8 : index
    %c0_109 = arith.constant 0 : index
    %c0_110 = arith.constant 0 : index
    %260 = vector.load %arg2[%c8_108, %c0_109, %c0_110] : memref<11x128x128xf32, #tpu.memory_space<vmem>>, vector<1x128x128xf32>
    %261 = vector.shape_cast %260 : vector<1x128x128xf32> to vector<128x128xf32>
    %cst_111 = arith.constant dense<0.000000e+00> : vector<8x128xf32>
    %262 = tpu.matmul %259, %261, %cst_111 {dimension_numbers = #tpu.dot_dimension_numbers<[1], [0], [0], [1], [0, 0, 1, 1], [], []>} : vector<8x128xf32>, vector<128x128xf32>, vector<8x128xf32> -> vector<8x128xf32>
    %c9 = arith.constant 9 : index
    %c0_112 = arith.constant 0 : index
    %c0_113 = arith.constant 0 : index
    %263 = vector.load %arg3[%c9, %c0_112, %c0_113] : memref<11x2x128xf32, #tpu.memory_space<vmem>>, vector<1x2x128xf32>
    %264 = vector.shape_cast %263 : vector<1x2x128xf32> to vector<2x128xf32>
    %265 = vector.extract_strided_slice %264 {offsets = [0, 0], sizes = [1, 128], strides = [1, 1]} : vector<2x128xf32> to vector<1x128xf32>
    %266 = vector.extract_strided_slice %264 {offsets = [1, 0], sizes = [1, 128], strides = [1, 1]} : vector<2x128xf32> to vector<1x128xf32>
    %cst_114 = arith.constant dense<0.000000e+00> : vector<128xf32>
    %267 = vector.multi_reduction <add>, %262, %cst_114 [0] : vector<8x128xf32> to vector<128xf32>
    %268 = vector.shape_cast %267 : vector<128xf32> to vector<1x128xf32>
    %cst_115 = arith.constant 8.000000e+00 : f32
    %269 = vector.broadcast %cst_115 : f32 to vector<1x128xf32>
    %270 = arith.divf %268, %269 : vector<1x128xf32>
    %271 = vector.broadcast %270 : vector<1x128xf32> to vector<8x128xf32>
    %272 = arith.subf %262, %271 : vector<8x128xf32>
    %273 = arith.mulf %272, %272 : vector<8x128xf32>
    %cst_116 = arith.constant dense<0.000000e+00> : vector<128xf32>
    %274 = vector.multi_reduction <add>, %273, %cst_116 [0] : vector<8x128xf32> to vector<128xf32>
    %275 = vector.shape_cast %274 : vector<128xf32> to vector<1x128xf32>
    %cst_117 = arith.constant 8.000000e+00 : f32
    %276 = vector.broadcast %cst_117 : f32 to vector<1x128xf32>
    %277 = arith.divf %275, %276 : vector<1x128xf32>
    %cst_118 = arith.constant 9.99999974E-6 : f32
    %278 = vector.broadcast %cst_118 : f32 to vector<1x128xf32>
    %279 = arith.addf %277, %278 : vector<1x128xf32>
    %280 = math.rsqrt %279 : vector<1x128xf32>
    %281 = arith.mulf %265, %280 : vector<1x128xf32>
    %282 = vector.broadcast %281 : vector<1x128xf32> to vector<8x128xf32>
    %283 = arith.mulf %272, %282 : vector<8x128xf32>
    %284 = vector.broadcast %266 : vector<1x128xf32> to vector<8x128xf32>
    %285 = arith.addf %283, %284 : vector<8x128xf32>
    %286 = arith.addf %285, %259 : vector<8x128xf32>
    %cst_119 = arith.constant 0.000000e+00 : f32
    %287 = vector.broadcast %cst_119 : f32 to vector<8x128xf32>
    %288 = arith.maximumf %286, %287 : vector<8x128xf32>
    %c9_120 = arith.constant 9 : index
    %c0_121 = arith.constant 0 : index
    %c0_122 = arith.constant 0 : index
    %289 = vector.load %arg2[%c9_120, %c0_121, %c0_122] : memref<11x128x128xf32, #tpu.memory_space<vmem>>, vector<1x128x128xf32>
    %290 = vector.shape_cast %289 : vector<1x128x128xf32> to vector<128x128xf32>
    %cst_123 = arith.constant dense<0.000000e+00> : vector<8x128xf32>
    %291 = tpu.matmul %288, %290, %cst_123 {dimension_numbers = #tpu.dot_dimension_numbers<[1], [0], [0], [1], [0, 0, 1, 1], [], []>} : vector<8x128xf32>, vector<128x128xf32>, vector<8x128xf32> -> vector<8x128xf32>
    %c10 = arith.constant 10 : index
    %c0_124 = arith.constant 0 : index
    %c0_125 = arith.constant 0 : index
    %292 = vector.load %arg3[%c10, %c0_124, %c0_125] : memref<11x2x128xf32, #tpu.memory_space<vmem>>, vector<1x2x128xf32>
    %293 = vector.shape_cast %292 : vector<1x2x128xf32> to vector<2x128xf32>
    %294 = vector.extract_strided_slice %293 {offsets = [0, 0], sizes = [1, 128], strides = [1, 1]} : vector<2x128xf32> to vector<1x128xf32>
    %295 = vector.extract_strided_slice %293 {offsets = [1, 0], sizes = [1, 128], strides = [1, 1]} : vector<2x128xf32> to vector<1x128xf32>
    %cst_126 = arith.constant dense<0.000000e+00> : vector<128xf32>
    %296 = vector.multi_reduction <add>, %291, %cst_126 [0] : vector<8x128xf32> to vector<128xf32>
    %297 = vector.shape_cast %296 : vector<128xf32> to vector<1x128xf32>
    %cst_127 = arith.constant 8.000000e+00 : f32
    %298 = vector.broadcast %cst_127 : f32 to vector<1x128xf32>
    %299 = arith.divf %297, %298 : vector<1x128xf32>
    %300 = vector.broadcast %299 : vector<1x128xf32> to vector<8x128xf32>
    %301 = arith.subf %291, %300 : vector<8x128xf32>
    %302 = arith.mulf %301, %301 : vector<8x128xf32>
    %cst_128 = arith.constant dense<0.000000e+00> : vector<128xf32>
    %303 = vector.multi_reduction <add>, %302, %cst_128 [0] : vector<8x128xf32> to vector<128xf32>
    %304 = vector.shape_cast %303 : vector<128xf32> to vector<1x128xf32>
    %cst_129 = arith.constant 8.000000e+00 : f32
    %305 = vector.broadcast %cst_129 : f32 to vector<1x128xf32>
    %306 = arith.divf %304, %305 : vector<1x128xf32>
    %cst_130 = arith.constant 9.99999974E-6 : f32
    %307 = vector.broadcast %cst_130 : f32 to vector<1x128xf32>
    %308 = arith.addf %306, %307 : vector<1x128xf32>
    %309 = math.rsqrt %308 : vector<1x128xf32>
    %310 = arith.mulf %294, %309 : vector<1x128xf32>
    %311 = vector.broadcast %310 : vector<1x128xf32> to vector<8x128xf32>
    %312 = arith.mulf %301, %311 : vector<8x128xf32>
    %313 = vector.broadcast %295 : vector<1x128xf32> to vector<8x128xf32>
    %314 = arith.addf %312, %313 : vector<8x128xf32>
    %315 = arith.addf %314, %288 : vector<8x128xf32>
    %cst_131 = arith.constant 0.000000e+00 : f32
    %316 = vector.broadcast %cst_131 : f32 to vector<8x128xf32>
    %317 = arith.maximumf %315, %316 : vector<8x128xf32>
    %c10_132 = arith.constant 10 : index
    %c0_133 = arith.constant 0 : index
    %c0_134 = arith.constant 0 : index
    %318 = vector.load %arg2[%c10_132, %c0_133, %c0_134] : memref<11x128x128xf32, #tpu.memory_space<vmem>>, vector<1x128x128xf32>
    %319 = vector.shape_cast %318 : vector<1x128x128xf32> to vector<128x128xf32>
    %cst_135 = arith.constant dense<0.000000e+00> : vector<8x128xf32>
    %320 = tpu.matmul %317, %319, %cst_135 {dimension_numbers = #tpu.dot_dimension_numbers<[1], [0], [0], [1], [0, 0, 1, 1], [], []>} : vector<8x128xf32>, vector<128x128xf32>, vector<8x128xf32> -> vector<8x128xf32>
    %c0_136 = arith.constant 0 : index
    %c0_137 = arith.constant 0 : index
    %321 = vector.load %arg4[%c0_136, %c0_137] : memref<1x128xf32, #tpu.memory_space<vmem>>, vector<1x128xf32>
    %322 = vector.broadcast %321 : vector<1x128xf32> to vector<8x128xf32>
    %323 = arith.addf %320, %322 : vector<8x128xf32>
    %c0_138 = arith.constant 0 : index
    %c0_139 = arith.constant 0 : index
    %324 = vector.load %arg5[%c0_138, %c0_139] : memref<8x128xf32, #tpu.memory_space<vmem>>, vector<8x128xf32>
    tpu.vector_store %arg5[%c0_138, %c0_139], %323 {strides = array<i32>} : memref<8x128xf32, #tpu.memory_space<vmem>>, vector<8x128xf32>,
    return
  }
}

</mosaic_0001>

<bundles_post_ra>
// kernel: residual_classifier.1
= control target key start
LH: loop header
LB: loop body
LE: loop exit
PB: predicated region body
PF: predicated region fallthrough
CT: control target
= control target key end

     0   :  { %10 = vsyncpa [#allocation3], 0  ;;  %s2783_s0 = inlined_call_operand.hbm [shape: f32[8,32], index: 0, kind: input, shape index: {}]   ;;  %s2784_s1 = inlined_call_operand.hbm [shape: f32[32,128], index: 1, kind: input, shape index: {}]   ;;  %s2785_s2 = inlined_call_operand.hbm [shape: f32[11,128,128], index: 2, kind: input, shape index: {}]   ;;  %s2786_s3 = inlined_call_operand.hbm [shape: f32[11,2,128], index: 3, kind: input, shape index: {}]   ;;  %s2787_s4 = inlined_call_operand.vmem [shape: f32[1,128], index: 4, kind: input, shape index: {}]   ;;  %s2788_s5 = inlined_call_operand.vmem [shape: f32[8,128], index: 5, kind: output, shape index: {}]  }
   0x1   :  { %11 = vsyncpa [#allocation5], 0 }
   0x2   :  { %12 = vsyncpa [#allocation8], 0  ;;  %s2472_s18 = smov [#allocation4]   ;;  %s2378_s22 = scalar_lea.hbm %s2784_s1, 512 }
   0x3   :  { %s28_s19 = sshll.u32 %s2472_s18, 4  ;;  %p2379_p0 = scmp.ne.s32.totalorder %s2784_s1, %s2378_s22  ;;  %s29_s19 = int_to_ptr.vmem [resolvable:$true] %s28_s19 }
   0x4   :  { %p2382_p1 = scmp.lt.u32.totalorder %s2378_s22, %s2784_s1 }
   0x6   :  { %p2384_p2 = pnand %p2382_p1, %p2379_p0 }
   0x8   :  { %2387 = shalt.err (!%p2384_p2)
}
   0x9   :  { %s2388_s27 = scalar_lea.vmem %s29_s19, 512  ;;  %p2393_p4 = scmp.lt.s32.totalorder %s29_s19, %s29_s19 }
   0xa   :  { %p2389_p3 = scmp.ne.s32.totalorder %s29_s19, %s2388_s27  ;;  %p2394_p5 = scmp.lt.s32.totalorder %s2388_s27, %s2388_s27 }
   0xc   :  { %p2395_p6 = por %p2394_p5, %p2393_p4 }
   0xe   :  { %p2396_p7 = pnand %p2395_p6, %p2389_p3 }
  0x10   :  { %2399 = shalt.err (!%p2396_p7)
}
  0x11   :  { %s2473_s28 = smov 128   ;;  %s2474_s29 = smov 8  }
  0x12   :  { %34 = dma.hbm_to_vmem [thread:$0]  %s2784_s1, 512, %s29_s19, [#allocation5], %s2473_s28, %s2473_s28, %s2474_s29  }
  0x13   :  { %s2475_s7 = smov [#allocation2]   ;;  %s2476_s9 = smov [#allocation6]  }
  0x14   :  { %s19_s8 = sshll.u32 %s2475_s7, 4  ;;  %s40_s10 = sshll.u32 %s2476_s9, 4  ;;  %s20_s8 = int_to_ptr.vmem [resolvable:$true] %s19_s8  ;;  %s41_s10 = int_to_ptr.vmem [resolvable:$true] %s40_s10 }
  0x15   :  { %s2400_s13 = scalar_lea.hbm %s2783_s0, 128 }
  0x16   :  { %p2401_p8 = scmp.ne.s32.totalorder %s2783_s0, %s2400_s13  ;;  %p2404_p9 = scmp.lt.u32.totalorder %s2400_s13, %s2783_s0 }
  0x18   :  { %p2406_p10 = pnand %p2404_p9, %p2401_p8 }
  0x1a   :  { %2409 = shalt.err (!%p2406_p10)
}
  0x1b   :  { %s2410_s1 = scalar_lea.vmem %s20_s8, 128  ;;  %p2415_p12 = scmp.lt.s32.totalorder %s20_s8, %s20_s8 }
  0x1c   :  { %p2411_p11 = scmp.ne.s32.totalorder %s20_s8, %s2410_s1  ;;  %p2416_p13 = scmp.lt.s32.totalorder %s2410_s1, %s2410_s1 }
  0x1e   :  { %p2417_p0 = por %p2416_p13, %p2415_p12 }
  0x20   :  { %p2418_p1 = pnand %p2417_p0, %p2411_p11 }
  0x22   :  { %2421 = shalt.err (!%p2418_p1)
}
  0x23   :  { %22 = dma.hbm_to_vmem [thread:$0]  %s2783_s0, 128, %s20_s8, [#allocation3]  }
  0x24   :  { %s2422_s22 = scalar_lea.hbm %s2785_s2, 22528 }
  0x25   :  { %p2423_p2 = scmp.ne.s32.totalorder %s2785_s2, %s2422_s22  ;;  %p2426_p3 = scmp.lt.u32.totalorder %s2422_s22, %s2785_s2 }
  0x27   :  { %p2428_p4 = pnand %p2426_p3, %p2423_p2 }
  0x29   :  { %2431 = shalt.err (!%p2428_p4)
}
  0x2a   :  { %s2432_s27 = scalar_lea.vmem %s41_s10, 22528  ;;  %p2437_p6 = scmp.lt.s32.totalorder %s41_s10, %s41_s10 }
  0x2b   :  { %p2433_p5 = scmp.ne.s32.totalorder %s41_s10, %s2432_s27  ;;  %p2438_p7 = scmp.lt.s32.totalorder %s2432_s27, %s2432_s27 }
  0x2d   :  { %p2439_p8 = por %p2438_p7, %p2437_p6 }
  0x2f   :  { %p2440_p9 = pnand %p2439_p8, %p2433_p5 }
  0x31   :  { %2443 = shalt.err (!%p2440_p9)
}
  0x32   :  { %46 = dma.hbm_to_vmem [thread:$0]  %s2785_s2, 22528, %s41_s10, [#allocation5], %s2473_s28, %s2473_s28, %s2474_s29  }
  0x33   :  { %s2477_s6 = smov [#allocation7]   ;;  %s2444_s11 = scalar_lea.hbm %s2786_s3, 352 }
  0x34   :  { %s52_s7 = sshll.u32 %s2477_s6, 4  ;;  %p2445_p10 = scmp.ne.s32.totalorder %s2786_s3, %s2444_s11  ;;  %s53_s7 = int_to_ptr.vmem [resolvable:$true] %s52_s7 }
  0x35   :  { %p2448_p11 = scmp.lt.u32.totalorder %s2444_s11, %s2786_s3 }
  0x37   :  { %p2450_p12 = pnand %p2448_p11, %p2445_p10 }
  0x39   :  { %2453 = shalt.err (!%p2450_p12)
}
  0x3a   :  { %s2454_s16 = scalar_lea.vmem %s53_s7, 352  ;;  %p2459_p0 = scmp.lt.s32.totalorder %s53_s7, %s53_s7 }
  0x3b   :  { %p2455_p13 = scmp.ne.s32.totalorder %s53_s7, %s2454_s16  ;;  %p2460_p1 = scmp.lt.s32.totalorder %s2454_s16, %s2454_s16 }
  0x3d   :  { %p2461_p2 = por %p2460_p1, %p2459_p0 }
  0x3f   :  { %p2462_p3 = pnand %p2461_p2, %p2455_p13 }
  0x41   :  { %2465 = shalt.err (!%p2462_p3)
}
  0x42   :  { %s2478_s2 = smov 32   ;;  %s2479_s28 = smov 2  }
  0x43   :  { %58 = dma.hbm_to_vmem [thread:$0]  %s2786_s3, 352, %s53_s7, [#allocation8], %s2478_s2, %s2478_s2, %s2479_s28  }
  0x44   :  { %2466 = dma.done.wait [#allocation3], 128  }
  0x45   :  { %2467 = vsyncadd [#allocation3], 4294967168 }
  0x46   :  { %2468 = dma.done.wait [#allocation5], 23040  }
  0x47   :  { %2469 = vsyncadd [#allocation5], 4294944256 }
  0x48   :  { %2470 = dma.done.wait [#allocation8], 352  }
  0x49   :  { %2471 = vsyncadd [#allocation8], 4294966944  ;;  %v2480_v0 = vmov 0.0|0.0   ;;  %vm2481_vm0 = vmmov 0   ;;  %v2482_v1 = vmov 0.0   ;;  %v74_v2 = vld [vmem:[#allocation4] sm:$0xff]  ;;  %v173_v52 = vlaneseq }
  0x4a   :  { %2075 = vmatprep.subr.bf16.mxu0 %v2480_v0  ;;  %1687 = vmatprep.mubr.msk.f32.mxu0 %vm2481_vm0, %v2482_v1  ;;  %v75_v3 = vld [vmem:[#allocation4 + $0x8] sm:$0xff]  ;;  %v76_v4 = vld [vmem:[#allocation4 + $0x10] sm:$0xff]  ;;  %v77_v6 = vld [vmem:[#allocation4 + $0x18] sm:$0xff]  ;;  %vm78_vm1 = vcmask 261120  }
  0x4b   :  { %2081 = vmatprep.subr.bf16.mxu1 %v2480_v0  ;;  %1722 = vmatprep.mubr.msk.f32.mxu1 %vm2481_vm0, %v2482_v1  ;;  %v2076_v5 = vpack.c.bf16 %v75_v3, %v74_v2  ;;  %v2079_v7 = vpack.c.bf16 %v77_v6, %v76_v4  ;;  %v73_v8 = vld [vmem:[#allocation2] sm:$0xff]  ;;  %v184_v9 = vld [vmem:[#allocation6] sm:$0xff]  ;;  %v185_v10 = vld [vmem:[#allocation6 + $0x8] sm:$0xff]  ;;  %v174_v53 = vshrl.u32 %v173_v52, 7 }
  0x4c   :  { %v2082_v11 = vpack.c.bf16 %v185_v10, %v184_v9  ;;  %v186_v12 = vld [vmem:[#allocation6 + $0x10] sm:$0xff]  ;;  %v187_v13 = vld [vmem:[#allocation6 + $0x18] sm:$0xff]  ;;  %v188_v15 = vld [vmem:[#allocation6 + $0x20] sm:$0xff] }
  0x4d   :  { %2077 = vmatpush3.bf16.msra.mxu0 %v2076_v5  ;;  %v2085_v14 = vpack.c.bf16 %v187_v13, %v186_v12  ;;  %v189_v16 = vld [vmem:[#allocation6 + $0x28] sm:$0xff]  ;;  %v190_v18 = vld [vmem:[#allocation6 + $0x30] sm:$0xff]  ;;  %v191_v19 = vld [vmem:[#allocation6 + $0x38] sm:$0xff]  ;;  %v2585_v55 = vsub.s32 0, %v174_v53  ;;  %v2587_v56 = vsub.s32 1, %v174_v53 }
  0x4e   :  { %2078 = vmatprep.subr.bf16.mxu0 %v2480_v0  ;;  %2083 = vmatpush3.bf16.msra.mxu1 %v2082_v11  ;;  %v2088_v17 = vpack.c.bf16 %v189_v16, %v188_v15  ;;  %v2091_v20 = vpack.c.bf16 %v191_v19, %v190_v18  ;;  %v192_v21 = vld [vmem:[#allocation6 + $0x40] sm:$0xff]  ;;  %v193_v22 = vld [vmem:[#allocation6 + $0x48] sm:$0xff]  ;;  %v194_v24 = vld [vmem:[#allocation6 + $0x50] sm:$0xff] }
  0x4f   :  { %2084 = vmatprep.subr.bf16.mxu1 %v2480_v0  ;;  %v2094_v23 = vpack.c.bf16 %v193_v22, %v192_v21  ;;  %v195_v25 = vld [vmem:[#allocation6 + $0x58] sm:$0xff]  ;;  %v196_v27 = vld [vmem:[#allocation6 + $0x60] sm:$0xff]  ;;  %v197_v28 = vld [vmem:[#allocation6 + $0x68] sm:$0xff] }
  0x50   :  { %v2097_v26 = vpack.c.bf16 %v195_v25, %v194_v24  ;;  %v2100_v29 = vpack.c.bf16 %v197_v28, %v196_v27  ;;  %v198_v30 = vld [vmem:[#allocation6 + $0x70] sm:$0xff]  ;;  %v199_v31 = vld [vmem:[#allocation6 + $0x78] sm:$0xff]  ;;  %v152_v54 = vld [vmem:[#allocation7] sm:$0x3] }
  0x51   :  { %2080 = vmatpush3.bf16.msra.mxu0 %v2079_v7  ;;  %v2103_v32 = vpack.c.bf16 %v199_v31, %v198_v30  ;;  %v181_v60 = vrot.slane %v152_v54, %v2587_v56  ;;  %v304_v2 = vld [vmem:[#allocation6 + $0x80] sm:$0xff]  ;;  %v305_v3 = vld [vmem:[#allocation6 + $0x88] sm:$0xff]  ;;  %v306_v5 = vld [vmem:[#allocation6 + $0x90] sm:$0xff] }
  0x52   :  { %2105 = vmatprep.subr.bf16.mxu0 %v2480_v0  ;;  %2086 = vmatpush3.bf16.msra.mxu1 %v2085_v14  ;;  %v2106_v4 = vpack.c.bf16 %v305_v3, %v304_v2  ;;  %v307_v6 = vld [vmem:[#allocation6 + $0x98] sm:$0xff]  ;;  %v309_v9 = vld [vmem:[#allocation6 + $0xa8] sm:$0xff]  ;;  %v310_v11 = vld [vmem:[#allocation6 + $0xb0] sm:$0xff] }
  0x53   :  { %2087 = vmatprep.subr.bf16.mxu1 %v2480_v0  ;;  %v2109_v7 = vpack.c.bf16 %v307_v6, %v306_v5  ;;  %v311_v12 = vld [vmem:[#allocation6 + $0xb8] sm:$0xff]  ;;  %v312_v14 = vld [vmem:[#allocation6 + $0xc0] sm:$0xff]  ;;  %v313_v15 = vld [vmem:[#allocation6 + $0xc8] sm:$0xff] }
  0x54   :  { %1688 = vmatmul.mubr.msk.f32.vlgmr.msra.gmra.mrb[0].mxu0 %vm78_vm1, %v73_v8  ;;  %v308_v8 = vld [vmem:[#allocation6 + $0xa0] sm:$0xff]  ;;  %v2115_v13 = vpack.c.bf16 %v311_v12, %v310_v11  ;;  %v2118_v16 = vpack.c.bf16 %v313_v15, %v312_v14  ;;  %v315_v18 = vld [vmem:[#allocation6 + $0xd8] sm:$0xff]  ;;  %v317_v21 = vld [vmem:[#allocation6 + $0xe8] sm:$0xff] }
  0x55   :  { %1757 = vmatprep.mubr.msk.f32.mxu0 %vm2481_vm0, %v2482_v1  ;;  %2107 = vmatpush3.bf16.msra.mxu0 %v2106_v4  ;;  %v2112_v10 = vpack.c.bf16 %v309_v9, %v308_v8  ;;  %v319_v24 = vld [vmem:[#allocation6 + $0xf8] sm:$0xff]  ;;  %v430_v3 = vld [vmem:[#allocation6 + $0x130] sm:$0xff]  ;;  %v432_v6 = vld [vmem:[#allocation6 + $0x140] sm:$0xff] }
  0x56   :  { %2089 = vmatpush3.bf16.msra.mxu1 %v2088_v17  ;;  %2108 = vmatprep.subr.bf16.mxu0 %v2480_v0  ;;  %v314_v17 = vld [vmem:[#allocation6 + $0xd0] sm:$0xff]  ;;  %v431_v4 = vld [vmem:[#allocation6 + $0x138] sm:$0xff]  ;;  %v436_v12 = vld [vmem:[#allocation6 + $0x160] sm:$0xff] }
  0x57   :  { %2090 = vmatprep.subr.bf16.mxu1 %v2480_v0  ;;  %v2121_v19 = vpack.c.bf16 %v315_v18, %v314_v17  ;;  %v2139_v5 = vpack.c.bf16 %v431_v4, %v430_v3  ;;  %v434_v9 = vld [vmem:[#allocation6 + $0x150] sm:$0xff]  ;;  %v556_v4 = vld [vmem:[#allocation6 + $0x1e0] sm:$0xff] }
  0x58   :  { %v438_v15 = vld [vmem:[#allocation6 + $0x170] sm:$0xff] }
  0x59   :  { %2110 = vmatpush3.bf16.msra.mxu0 %v2109_v7  ;;  %v433_v7 = vld [vmem:[#allocation6 + $0x148] sm:$0xff] }
  0x5a   :  { %2092 = vmatpush3.bf16.msra.mxu1 %v2091_v20  ;;  %2111 = vmatprep.subr.bf16.mxu0 %v2480_v0  ;;  %v316_v20 = vld [vmem:[#allocation6 + $0xe0] sm:$0xff]  ;;  %v2142_v8 = vpack.c.bf16 %v433_v7, %v432_v6  ;;  %v558_v7 = vld [vmem:[#allocation6 + $0x1f0] sm:$0xff] }
  0x5b   :  { %2093 = vmatprep.subr.bf16.mxu1 %v2480_v0  ;;  %v2124_v22 = vpack.c.bf16 %v317_v21, %v316_v20 }
  0x5d   :  { %2113 = vmatpush3.bf16.msra.mxu0 %v2112_v10  ;;  %v435_v10 = vld [vmem:[#allocation6 + $0x158] sm:$0xff] }
  0x5e   :  { %2095 = vmatpush3.bf16.msra.mxu1 %v2094_v23  ;;  %2114 = vmatprep.subr.bf16.mxu0 %v2480_v0  ;;  %v318_v23 = vld [vmem:[#allocation6 + $0xf0] sm:$0xff]  ;;  %v2145_v11 = vpack.c.bf16 %v435_v10, %v434_v9 }
  0x5f   :  { %2096 = vmatprep.subr.bf16.mxu1 %v2480_v0  ;;  %v2127_v25 = vpack.c.bf16 %v319_v24, %v318_v23 }
  0x61   :  { %2116 = vmatpush3.bf16.msra.mxu0 %v2115_v13  ;;  %v437_v13 = vld [vmem:[#allocation6 + $0x168] sm:$0xff] }
  0x62   :  { %2098 = vmatpush3.bf16.msra.mxu1 %v2097_v26  ;;  %2117 = vmatprep.subr.bf16.mxu0 %v2480_v0  ;;  %v2148_v14 = vpack.c.bf16 %v437_v13, %v436_v12 }
  0x63   :  { %2099 = vmatprep.subr.bf16.mxu1 %v2480_v0 }
  0x65   :  { %2119 = vmatpush3.bf16.msra.mxu0 %v2118_v16  ;;  %v439_v16 = vld [vmem:[#allocation6 + $0x178] sm:$0xff] }
  0x66   :  { %2101 = vmatpush3.bf16.msra.mxu1 %v2100_v29  ;;  %2120 = vmatprep.subr.bf16.mxu0 %v2480_v0  ;;  %v2151_v17 = vpack.c.bf16 %v439_v16, %v438_v15 }
  0x67   :  { %2102 = vmatprep.subr.bf16.mxu1 %v2480_v0 }
  0x69   :  { %2122 = vmatpush3.bf16.msra.mxu0 %v2121_v19 }
  0x6a   :  { %2104 = vmatpush3.bf16.msra.mxu1 %v2103_v32  ;;  %2123 = vmatprep.subr.bf16.mxu0 %v2480_v0 }
  0x6b   :  { %2129 = vmatprep.subr.bf16.mxu1 %v2480_v0 }
  0x6d   :  { %2125 = vmatpush3.bf16.msra.mxu0 %v2124_v22 }
  0x6e   :  { %2126 = vmatprep.subr.bf16.mxu0 %v2480_v0 }
  0x71   :  { %2128 = vmatpush3.bf16.msra.mxu0 %v2127_v25 }
  0x72   :  { %2153 = vmatprep.subr.bf16.mxu0 %v2480_v0 }
 0x127   :  { %v148_v33 = vpop.f32.mrb[0].mxu0 }
 0x128   :  { %v153_v34 = vrot.slane %v148_v33, 4  ;;  %v1689_v35 = vpop.f32.mrb[1].mxu0 }
 0x12a   :  { %v154_v36 = vadd.f32 %v153_v34, %v148_v33 }
 0x12c   :  { %v155_v37 = vrot.slane %v154_v36, 2 }
 0x12e   :  { %v156_v38 = vadd.f32 %v155_v37, %v154_v36 }
 0x130   :  { %v157_v39 = vrot.slane %v156_v38, 1 }
 0x132   :  { %v158_v40 = vadd.f32 %v157_v39, %v156_v38 }
 0x134   :  { %v160_v41 = vmul.f32 0.125, %v158_v40 }
 0x136   :  { %v161_v42 = vsub.f32 %v148_v33, %v160_v41 }
 0x138   :  { %v162_v43 = vmul.f32 %v161_v42, %v161_v42 }
 0x13a   :  { %v163_v44 = vrot.slane %v162_v43, 4 }
 0x13c   :  { %v164_v45 = vadd.f32 %v163_v44, %v162_v43 }
 0x13e   :  { %v165_v46 = vrot.slane %v164_v45, 2 }
 0x140   :  { %v166_v47 = vadd.f32 %v165_v46, %v164_v45  ;;  %v271_v45 = vld [vmem:[#allocation7 + $0x2] sm:$0x3] }
 0x142   :  { %v167_v48 = vrot.slane %v166_v47, 1 }
 0x144   :  { %v168_v49 = vadd.f32 %v167_v48, %v166_v47 }
 0x146   :  { %v169_v50 = vmul.f32 0.125, %v168_v49  ;;  %v299_v49 = vrot.slane %v271_v45, %v2587_v56 }
 0x148   :  { %v170_v51 = vadd.f32 1e-05, %v169_v50 }
 0x14a   :  { %2356 = vrsqrt.f32 %v170_v51 }
 0x154   :  { %v2357_v57 = vpop.eup %2356 }
 0x155   :  { %v172_v58 = vmul.f32 %v2357_v57, %v152_v54  ;;  %v424_v54 = vld [vmem:[#allocation6 + $0x100] sm:$0xff]  ;;  %v425_v57 = vld [vmem:[#allocation6 + $0x108] sm:$0xff] }
 0x157   :  { %v176_v59 = vrot.slane %v172_v58, %v2585_v55  ;;  %v2130_v58 = vpack.c.bf16 %v425_v57, %v424_v54  ;;  %v550_v57 = vld [vmem:[#allocation6 + $0x1b0] sm:$0xff] }
 0x159   :  { %v177_v61 = vmul.f32 %v176_v59, %v161_v42  ;;  %v426_v59 = vld [vmem:[#allocation6 + $0x110] sm:$0xff] }
 0x15b   :  { %v2591_v62 = vadd.f32 %v181_v60, %v177_v61  ;;  %v427_v60 = vld [vmem:[#allocation6 + $0x118] sm:$0xff] }
 0x15c   :  { %v2133_v61 = vpack.c.bf16 %v427_v60, %v426_v59  ;;  %v552_v60 = vld [vmem:[#allocation6 + $0x1c0] sm:$0xff] }
 0x15d   :  { %v183_v63 = vmax.f32 %v2591_v62, 0.0  ;;  %v428_v62 = vld [vmem:[#allocation6 + $0x120] sm:$0xff] }
 0x15f   :  { %1723 = vmatmul.mubr.f32.vlgmr.msra.gmra.mrb[0].mxu1 %v183_v63 }
 0x160   :  { %1792 = vmatprep.mubr.msk.f32.mxu1 %vm2481_vm0, %v2482_v1  ;;  %2131 = vmatpush3.bf16.msra.mxu1 %v2130_v58  ;;  %v551_v58 = vld [vmem:[#allocation6 + $0x1b8] sm:$0xff] }
 0x161   :  { %2132 = vmatprep.subr.bf16.mxu1 %v2480_v0  ;;  %v2163_v59 = vpack.c.bf16 %v551_v58, %v550_v57  ;;  %v676_v58 = vld [vmem:[#allocation6 + $0x260] sm:$0xff] }
 0x164   :  { %2134 = vmatpush3.bf16.msra.mxu1 %v2133_v61  ;;  %v553_v61 = vld [vmem:[#allocation6 + $0x1c8] sm:$0xff] }
 0x165   :  { %2135 = vmatprep.subr.bf16.mxu1 %v2480_v0 }
 0x232   :  { %v266_v26 = vpop.f32.mrb[0].mxu1 }
 0x233   :  { %v272_v27 = vrot.slane %v266_v26, 4  ;;  %v1724_v28 = vpop.f32.mrb[1].mxu1 }
 0x235   :  { %v273_v29 = vadd.f32 %v272_v27, %v266_v26 }
 0x237   :  { %v274_v30 = vrot.slane %v273_v29, 2 }
 0x239   :  { %v275_v31 = vadd.f32 %v274_v30, %v273_v29 }
 0x23b   :  { %v276_v32 = vrot.slane %v275_v31, 1 }
 0x23d   :  { %v277_v33 = vadd.f32 %v276_v32, %v275_v31 }
 0x23f   :  { %v278_v34 = vmul.f32 0.125, %v277_v33 }
 0x241   :  { %v279_v35 = vsub.f32 %v266_v26, %v278_v34 }
 0x243   :  { %v280_v36 = vmul.f32 %v279_v35, %v279_v35 }
 0x245   :  { %v281_v37 = vrot.slane %v280_v36, 4 }
 0x247   :  { %v282_v38 = vadd.f32 %v281_v37, %v280_v36  ;;  %v391_v37 = vld [vmem:[#allocation7 + $0x4] sm:$0x3] }
 0x249   :  { %v283_v39 = vrot.slane %v282_v38, 2 }
 0x24b   :  { %v284_v40 = vadd.f32 %v283_v39, %v282_v38 }
 0x24d   :  { %v285_v41 = vrot.slane %v284_v40, 1 }
 0x24f   :  { %v286_v42 = vadd.f32 %v285_v41, %v284_v40  ;;  %v419_v41 = vrot.slane %v391_v37, %v2587_v56 }
 0x251   :  { %v287_v43 = vmul.f32 0.125, %v286_v42 }
 0x253   :  { %v288_v44 = vadd.f32 1e-05, %v287_v43 }
 0x255   :  { %2358 = vrsqrt.f32 %v288_v44 }
 0x25f   :  { %v2359_v46 = vpop.eup %2358 }
 0x260   :  { %v290_v47 = vmul.f32 %v2359_v46, %v271_v45  ;;  %v544_v46 = vld [vmem:[#allocation6 + $0x180] sm:$0xff] }
 0x262   :  { %v294_v48 = vrot.slane %v290_v47, %v2585_v55  ;;  %v545_v47 = vld [vmem:[#allocation6 + $0x188] sm:$0xff] }
 0x264   :  { %v295_v50 = vmul.f32 %v294_v48, %v279_v35  ;;  %v2154_v48 = vpack.c.bf16 %v545_v47, %v544_v46  ;;  %v670_v47 = vld [vmem:[#allocation6 + $0x230] sm:$0xff] }
 0x266   :  { %v300_v51 = vadd.f32 %v299_v49, %v295_v50  ;;  %v546_v49 = vld [vmem:[#allocation6 + $0x190] sm:$0xff]  ;;  %v547_v50 = vld [vmem:[#allocation6 + $0x198] sm:$0xff] }
 0x268   :  { %v2610_v52 = vadd.f32 %v300_v51, %v183_v63  ;;  %v429_v63 = vld [vmem:[#allocation6 + $0x128] sm:$0xff]  ;;  %v2157_v51 = vpack.c.bf16 %v547_v50, %v546_v49  ;;  %v672_v50 = vld [vmem:[#allocation6 + $0x240] sm:$0xff] }
 0x269   :  { %v2136_v2 = vpack.c.bf16 %v429_v63, %v428_v62  ;;  %v2166_v62 = vpack.c.bf16 %v553_v61, %v552_v60  ;;  %v554_v63 = vld [vmem:[#allocation6 + $0x1d0] sm:$0xff] }
 0x26a   :  { %v302_v53 = vmax.f32 %v2610_v52, 0.0  ;;  %v548_v52 = vld [vmem:[#allocation6 + $0x1a0] sm:$0xff]  ;;  %v678_v61 = vld [vmem:[#allocation6 + $0x270] sm:$0xff] }
 0x26b   :  { %2137 = vmatpush3.bf16.msra.mxu1 %v2136_v2  ;;  %v555_v2 = vld [vmem:[#allocation6 + $0x1d8] sm:$0xff] }
 0x26c   :  { %1758 = vmatmul.mubr.f32.vlgmr.msra.gmra.mrb[2].mxu0 %v302_v53  ;;  %2138 = vmatprep.subr.bf16.mxu1 %v2480_v0  ;;  %v2169_v3 = vpack.c.bf16 %v555_v2, %v554_v63 }
 0x26d   :  { %1827 = vmatprep.mubr.msk.f32.mxu0 %vm2481_vm0, %v2482_v1  ;;  %2155 = vmatpush3.bf16.msra.mxu0 %v2154_v48  ;;  %v671_v48 = vld [vmem:[#allocation6 + $0x238] sm:$0xff] }
 0x26e   :  { %2156 = vmatprep.subr.bf16.mxu0 %v2480_v0  ;;  %v2187_v49 = vpack.c.bf16 %v671_v48, %v670_v47  ;;  %v796_v48 = vld [vmem:[#allocation6 + $0x2e0] sm:$0xff] }
 0x26f   :  { %2140 = vmatpush3.bf16.msra.mxu1 %v2139_v5  ;;  %v557_v5 = vld [vmem:[#allocation6 + $0x1e8] sm:$0xff] }
 0x270   :  { %2141 = vmatprep.subr.bf16.mxu1 %v2480_v0  ;;  %v2172_v6 = vpack.c.bf16 %v557_v5, %v556_v4 }
 0x271   :  { %2158 = vmatpush3.bf16.msra.mxu0 %v2157_v51  ;;  %v673_v51 = vld [vmem:[#allocation6 + $0x248] sm:$0xff] }
 0x272   :  { %2159 = vmatprep.subr.bf16.mxu0 %v2480_v0 }
 0x273   :  { %2143 = vmatpush3.bf16.msra.mxu1 %v2142_v8  ;;  %v559_v8 = vld [vmem:[#allocation6 + $0x1f8] sm:$0xff] }
 0x274   :  { %2144 = vmatprep.subr.bf16.mxu1 %v2480_v0  ;;  %v2175_v9 = vpack.c.bf16 %v559_v8, %v558_v7 }
 0x277   :  { %2146 = vmatpush3.bf16.msra.mxu1 %v2145_v11 }
 0x278   :  { %2147 = vmatprep.subr.bf16.mxu1 %v2480_v0 }
 0x27b   :  { %2149 = vmatpush3.bf16.msra.mxu1 %v2148_v14 }
 0x27c   :  { %2150 = vmatprep.subr.bf16.mxu1 %v2480_v0 }
 0x27f   :  { %2152 = vmatpush3.bf16.msra.mxu1 %v2151_v17 }
 0x280   :  { %2177 = vmatprep.subr.bf16.mxu1 %v2480_v0 }
 0x33f   :  { %v386_v18 = vpop.f32.mrb[2].mxu0 }
 0x340   :  { %v392_v19 = vrot.slane %v386_v18, 4  ;;  %v1759_v20 = vpop.f32.mrb[3].mxu0 }
 0x342   :  { %v393_v21 = vadd.f32 %v392_v19, %v386_v18 }
 0x344   :  { %v394_v22 = vrot.slane %v393_v21, 2 }
 0x346   :  { %v395_v23 = vadd.f32 %v394_v22, %v393_v21 }
 0x348   :  { %v396_v24 = vrot.slane %v395_v23, 1 }
 0x34a   :  { %v397_v25 = vadd.f32 %v396_v24, %v395_v23 }
 0x34c   :  { %v398_v26 = vmul.f32 0.125, %v397_v25 }
 0x34e   :  { %v399_v27 = vsub.f32 %v386_v18, %v398_v26 }
 0x350   :  { %v400_v28 = vmul.f32 %v399_v27, %v399_v27 }
 0x352   :  { %v401_v29 = vrot.slane %v400_v28, 4 }
 0x354   :  { %v402_v30 = vadd.f32 %v401_v29, %v400_v28  ;;  %v511_v29 = vld [vmem:[#allocation7 + $0x6] sm:$0x3] }
 0x356   :  { %v403_v31 = vrot.slane %v402_v30, 2 }
 0x358   :  { %v404_v32 = vadd.f32 %v403_v31, %v402_v30 }
 0x35a   :  { %v405_v33 = vrot.slane %v404_v32, 1 }
 0x35c   :  { %v406_v34 = vadd.f32 %v405_v33, %v404_v32  ;;  %v539_v33 = vrot.slane %v511_v29, %v2587_v56 }
 0x35e   :  { %v407_v35 = vmul.f32 0.125, %v406_v34 }
 0x360   :  { %v408_v36 = vadd.f32 1e-05, %v407_v35 }
 0x362   :  { %2360 = vrsqrt.f32 %v408_v36 }
 0x36c   :  { %v2361_v38 = vpop.eup %2360 }
 0x36d   :  { %v410_v39 = vmul.f32 %v2361_v38, %v391_v37  ;;  %v664_v38 = vld [vmem:[#allocation6 + $0x200] sm:$0xff] }
 0x36f   :  { %v414_v40 = vrot.slane %v410_v39, %v2585_v55  ;;  %v665_v39 = vld [vmem:[#allocation6 + $0x208] sm:$0xff] }
 0x371   :  { %v415_v42 = vmul.f32 %v414_v40, %v399_v27  ;;  %v2178_v40 = vpack.c.bf16 %v665_v39, %v664_v38  ;;  %v790_v39 = vld [vmem:[#allocation6 + $0x2b0] sm:$0xff] }
 0x373   :  { %v420_v43 = vadd.f32 %v419_v41, %v415_v42  ;;  %v666_v41 = vld [vmem:[#allocation6 + $0x210] sm:$0xff]  ;;  %v667_v42 = vld [vmem:[#allocation6 + $0x218] sm:$0xff] }
 0x375   :  { %v2629_v44 = vadd.f32 %v420_v43, %v302_v53  ;;  %v549_v53 = vld [vmem:[#allocation6 + $0x1a8] sm:$0xff]  ;;  %v2181_v43 = vpack.c.bf16 %v667_v42, %v666_v41  ;;  %v792_v42 = vld [vmem:[#allocation6 + $0x2c0] sm:$0xff] }
 0x376   :  { %v2160_v54 = vpack.c.bf16 %v549_v53, %v548_v52  ;;  %v2190_v52 = vpack.c.bf16 %v673_v51, %v672_v50  ;;  %v674_v53 = vld [vmem:[#allocation6 + $0x250] sm:$0xff] }
 0x377   :  { %v422_v45 = vmax.f32 %v2629_v44, 0.0  ;;  %v668_v44 = vld [vmem:[#allocation6 + $0x220] sm:$0xff]  ;;  %v798_v51 = vld [vmem:[#allocation6 + $0x2f0] sm:$0xff] }
 0x378   :  { %2161 = vmatpush3.bf16.msra.mxu0 %v2160_v54  ;;  %v675_v54 = vld [vmem:[#allocation6 + $0x258] sm:$0xff] }
 0x379   :  { %1793 = vmatmul.mubr.f32.vlgmr.msra.gmra.mrb[2].mxu1 %v422_v45  ;;  %2162 = vmatprep.subr.bf16.mxu0 %v2480_v0  ;;  %v2193_v57 = vpack.c.bf16 %v675_v54, %v674_v53 }
 0x37a   :  { %1862 = vmatprep.mubr.msk.f32.mxu1 %vm2481_vm0, %v2482_v1  ;;  %2179 = vmatpush3.bf16.msra.mxu1 %v2178_v40  ;;  %v791_v40 = vld [vmem:[#allocation6 + $0x2b8] sm:$0xff] }
 0x37b   :  { %2180 = vmatprep.subr.bf16.mxu1 %v2480_v0  ;;  %v2211_v41 = vpack.c.bf16 %v791_v40, %v790_v39  ;;  %v916_v40 = vld [vmem:[#allocation6 + $0x360] sm:$0xff] }
 0x37c   :  { %2164 = vmatpush3.bf16.msra.mxu0 %v2163_v59  ;;  %v677_v59 = vld [vmem:[#allocation6 + $0x268] sm:$0xff] }
 0x37d   :  { %2165 = vmatprep.subr.bf16.mxu0 %v2480_v0  ;;  %v2196_v60 = vpack.c.bf16 %v677_v59, %v676_v58 }
 0x37e   :  { %2182 = vmatpush3.bf16.msra.mxu1 %v2181_v43  ;;  %v793_v43 = vld [vmem:[#allocation6 + $0x2c8] sm:$0xff] }
 0x37f   :  { %2183 = vmatprep.subr.bf16.mxu1 %v2480_v0 }
 0x380   :  { %2167 = vmatpush3.bf16.msra.mxu0 %v2166_v62  ;;  %v679_v62 = vld [vmem:[#allocation6 + $0x278] sm:$0xff] }
 0x381   :  { %2168 = vmatprep.subr.bf16.mxu0 %v2480_v0  ;;  %v2199_v63 = vpack.c.bf16 %v679_v62, %v678_v61 }
 0x384   :  { %2170 = vmatpush3.bf16.msra.mxu0 %v2169_v3 }
 0x385   :  { %2171 = vmatprep.subr.bf16.mxu0 %v2480_v0 }
 0x388   :  { %2173 = vmatpush3.bf16.msra.mxu0 %v2172_v6 }
 0x389   :  { %2174 = vmatprep.subr.bf16.mxu0 %v2480_v0 }
 0x38c   :  { %2176 = vmatpush3.bf16.msra.mxu0 %v2175_v9 }
 0x38d   :  { %2201 = vmatprep.subr.bf16.mxu0 %v2480_v0 }
 0x44c   :  { %v506_v10 = vpop.f32.mrb[2].mxu1 }
 0x44d   :  { %v512_v11 = vrot.slane %v506_v10, 4  ;;  %v1794_v12 = vpop.f32.mrb[3].mxu1 }
 0x44f   :  { %v513_v13 = vadd.f32 %v512_v11, %v506_v10 }
 0x451   :  { %v514_v14 = vrot.slane %v513_v13, 2 }
 0x453   :  { %v515_v15 = vadd.f32 %v514_v14, %v513_v13 }
 0x455   :  { %v516_v16 = vrot.slane %v515_v15, 1 }
 0x457   :  { %v517_v17 = vadd.f32 %v516_v16, %v515_v15 }
 0x459   :  { %v518_v18 = vmul.f32 0.125, %v517_v17 }
 0x45b   :  { %v519_v19 = vsub.f32 %v506_v10, %v518_v18 }
 0x45d   :  { %v520_v20 = vmul.f32 %v519_v19, %v519_v19 }
 0x45f   :  { %v521_v21 = vrot.slane %v520_v20, 4 }
 0x461   :  { %v522_v22 = vadd.f32 %v521_v21, %v520_v20  ;;  %v631_v21 = vld [vmem:[#allocation7 + $0x8] sm:$0x3] }
 0x463   :  { %v523_v23 = vrot.slane %v522_v22, 2 }
 0x465   :  { %v524_v24 = vadd.f32 %v523_v23, %v522_v22 }
 0x467   :  { %v525_v25 = vrot.slane %v524_v24, 1 }
 0x469   :  { %v526_v26 = vadd.f32 %v525_v25, %v524_v24  ;;  %v659_v25 = vrot.slane %v631_v21, %v2587_v56 }
 0x46b   :  { %v527_v27 = vmul.f32 0.125, %v526_v26 }
 0x46d   :  { %v528_v28 = vadd.f32 1e-05, %v527_v27 }
 0x46f   :  { %2362 = vrsqrt.f32 %v528_v28 }
 0x479   :  { %v2363_v30 = vpop.eup %2362 }
 0x47a   :  { %v530_v31 = vmul.f32 %v2363_v30, %v511_v29  ;;  %v784_v30 = vld [vmem:[#allocation6 + $0x280] sm:$0xff] }
 0x47c   :  { %v534_v32 = vrot.slane %v530_v31, %v2585_v55  ;;  %v785_v31 = vld [vmem:[#allocation6 + $0x288] sm:$0xff] }
 0x47e   :  { %v535_v34 = vmul.f32 %v534_v32, %v519_v19  ;;  %v2202_v32 = vpack.c.bf16 %v785_v31, %v784_v30  ;;  %v910_v31 = vld [vmem:[#allocation6 + $0x330] sm:$0xff] }
 0x480   :  { %v540_v35 = vadd.f32 %v539_v33, %v535_v34  ;;  %v786_v33 = vld [vmem:[#allocation6 + $0x290] sm:$0xff]  ;;  %v787_v34 = vld [vmem:[#allocation6 + $0x298] sm:$0xff] }
 0x482   :  { %v2648_v36 = vadd.f32 %v540_v35, %v422_v45  ;;  %v669_v45 = vld [vmem:[#allocation6 + $0x228] sm:$0xff]  ;;  %v2205_v35 = vpack.c.bf16 %v787_v34, %v786_v33  ;;  %v912_v34 = vld [vmem:[#allocation6 + $0x340] sm:$0xff] }
 0x483   :  { %v2184_v46 = vpack.c.bf16 %v669_v45, %v668_v44  ;;  %v2214_v44 = vpack.c.bf16 %v793_v43, %v792_v42  ;;  %v794_v45 = vld [vmem:[#allocation6 + $0x2d0] sm:$0xff] }
 0x484   :  { %v542_v37 = vmax.f32 %v2648_v36, 0.0  ;;  %v788_v36 = vld [vmem:[#allocation6 + $0x2a0] sm:$0xff]  ;;  %v918_v43 = vld [vmem:[#allocation6 + $0x370] sm:$0xff] }
 0x485   :  { %2185 = vmatpush3.bf16.msra.mxu1 %v2184_v46  ;;  %v795_v46 = vld [vmem:[#allocation6 + $0x2d8] sm:$0xff] }
 0x486   :  { %1828 = vmatmul.mubr.f32.vlgmr.msra.gmra.mrb[4].mxu0 %v542_v37  ;;  %2186 = vmatprep.subr.bf16.mxu1 %v2480_v0  ;;  %v2217_v47 = vpack.c.bf16 %v795_v46, %v794_v45 }
 0x487   :  { %1897 = vmatprep.mubr.msk.f32.mxu0 %vm2481_vm0, %v2482_v1  ;;  %2203 = vmatpush3.bf16.msra.mxu0 %v2202_v32  ;;  %v911_v32 = vld [vmem:[#allocation6 + $0x338] sm:$0xff] }
 0x488   :  { %2204 = vmatprep.subr.bf16.mxu0 %v2480_v0  ;;  %v2235_v33 = vpack.c.bf16 %v911_v32, %v910_v31  ;;  %v1036_v32 = vld [vmem:[#allocation6 + $0x3e0] sm:$0xff] }
 0x489   :  { %2188 = vmatpush3.bf16.msra.mxu1 %v2187_v49  ;;  %v797_v49 = vld [vmem:[#allocation6 + $0x2e8] sm:$0xff] }
 0x48a   :  { %2189 = vmatprep.subr.bf16.mxu1 %v2480_v0  ;;  %v2220_v50 = vpack.c.bf16 %v797_v49, %v796_v48 }
 0x48b   :  { %2206 = vmatpush3.bf16.msra.mxu0 %v2205_v35  ;;  %v913_v35 = vld [vmem:[#allocation6 + $0x348] sm:$0xff] }
 0x48c   :  { %2207 = vmatprep.subr.bf16.mxu0 %v2480_v0 }
 0x48d   :  { %2191 = vmatpush3.bf16.msra.mxu1 %v2190_v52  ;;  %v799_v52 = vld [vmem:[#allocation6 + $0x2f8] sm:$0xff] }
 0x48e   :  { %2192 = vmatprep.subr.bf16.mxu1 %v2480_v0  ;;  %v2223_v53 = vpack.c.bf16 %v799_v52, %v798_v51 }
 0x491   :  { %2194 = vmatpush3.bf16.msra.mxu1 %v2193_v57 }
 0x492   :  { %2195 = vmatprep.subr.bf16.mxu1 %v2480_v0 }
 0x495   :  { %2197 = vmatpush3.bf16.msra.mxu1 %v2196_v60 }
 0x496   :  { %2198 = vmatprep.subr.bf16.mxu1 %v2480_v0 }
 0x499   :  { %2200 = vmatpush3.bf16.msra.mxu1 %v2199_v63 }
 0x49a   :  { %2225 = vmatprep.subr.bf16.mxu1 %v2480_v0 }
 0x559   :  { %v626_v2 = vpop.f32.mrb[4].mxu0 }
 0x55a   :  { %v632_v3 = vrot.slane %v626_v2, 4  ;;  %v1829_v4 = vpop.f32.mrb[5].mxu0 }
 0x55c   :  { %v633_v5 = vadd.f32 %v632_v3, %v626_v2 }
 0x55e   :  { %v634_v6 = vrot.slane %v633_v5, 2 }
 0x560   :  { %v635_v7 = vadd.f32 %v634_v6, %v633_v5 }
 0x562   :  { %v636_v8 = vrot.slane %v635_v7, 1 }
 0x564   :  { %v637_v9 = vadd.f32 %v636_v8, %v635_v7 }
 0x566   :  { %v638_v10 = vmul.f32 0.125, %v637_v9 }
 0x568   :  { %v639_v11 = vsub.f32 %v626_v2, %v638_v10 }
 0x56a   :  { %v640_v12 = vmul.f32 %v639_v11, %v639_v11 }
 0x56c   :  { %v641_v13 = vrot.slane %v640_v12, 4 }
 0x56e   :  { %v642_v14 = vadd.f32 %v641_v13, %v640_v12  ;;  %v751_v13 = vld [vmem:[#allocation7 + $0xa] sm:$0x3] }
 0x570   :  { %v643_v15 = vrot.slane %v642_v14, 2 }
 0x572   :  { %v644_v16 = vadd.f32 %v643_v15, %v642_v14 }
 0x574   :  { %v645_v17 = vrot.slane %v644_v16, 1 }
 0x576   :  { %v646_v18 = vadd.f32 %v645_v17, %v644_v16  ;;  %v779_v17 = vrot.slane %v751_v13, %v2587_v56 }
 0x578   :  { %v647_v19 = vmul.f32 0.125, %v646_v18 }
 0x57a   :  { %v648_v20 = vadd.f32 1e-05, %v647_v19 }
 0x57c   :  { %2364 = vrsqrt.f32 %v648_v20 }
 0x586   :  { %v2365_v22 = vpop.eup %2364 }
 0x587   :  { %v650_v23 = vmul.f32 %v2365_v22, %v631_v21  ;;  %v904_v22 = vld [vmem:[#allocation6 + $0x300] sm:$0xff] }
 0x589   :  { %v654_v24 = vrot.slane %v650_v23, %v2585_v55  ;;  %v905_v23 = vld [vmem:[#allocation6 + $0x308] sm:$0xff] }
 0x58b   :  { %v655_v26 = vmul.f32 %v654_v24, %v639_v11  ;;  %v2226_v24 = vpack.c.bf16 %v905_v23, %v904_v22  ;;  %v1030_v23 = vld [vmem:[#allocation6 + $0x3b0] sm:$0xff] }
 0x58d   :  { %v660_v27 = vadd.f32 %v659_v25, %v655_v26  ;;  %v906_v25 = vld [vmem:[#allocation6 + $0x310] sm:$0xff]  ;;  %v907_v26 = vld [vmem:[#allocation6 + $0x318] sm:$0xff] }
 0x58f   :  { %v2667_v28 = vadd.f32 %v660_v27, %v542_v37  ;;  %v789_v37 = vld [vmem:[#allocation6 + $0x2a8] sm:$0xff]  ;;  %v2229_v27 = vpack.c.bf16 %v907_v26, %v906_v25  ;;  %v1032_v26 = vld [vmem:[#allocation6 + $0x3c0] sm:$0xff] }
 0x590   :  { %v2208_v38 = vpack.c.bf16 %v789_v37, %v788_v36  ;;  %v2238_v36 = vpack.c.bf16 %v913_v35, %v912_v34  ;;  %v914_v37 = vld [vmem:[#allocation6 + $0x350] sm:$0xff] }
 0x591   :  { %v662_v29 = vmax.f32 %v2667_v28, 0.0  ;;  %v908_v28 = vld [vmem:[#allocation6 + $0x320] sm:$0xff]  ;;  %v1038_v35 = vld [vmem:[#allocation6 + $0x3f0] sm:$0xff] }
 0x592   :  { %2209 = vmatpush3.bf16.msra.mxu0 %v2208_v38  ;;  %v915_v38 = vld [vmem:[#allocation6 + $0x358] sm:$0xff] }
 0x593   :  { %1863 = vmatmul.mubr.f32.vlgmr.msra.gmra.mrb[4].mxu1 %v662_v29  ;;  %2210 = vmatprep.subr.bf16.mxu0 %v2480_v0  ;;  %v2241_v39 = vpack.c.bf16 %v915_v38, %v914_v37 }
 0x594   :  { %1932 = vmatprep.mubr.msk.f32.mxu1 %vm2481_vm0, %v2482_v1  ;;  %2227 = vmatpush3.bf16.msra.mxu1 %v2226_v24  ;;  %v1031_v24 = vld [vmem:[#allocation6 + $0x3b8] sm:$0xff] }
 0x595   :  { %2228 = vmatprep.subr.bf16.mxu1 %v2480_v0  ;;  %v2259_v25 = vpack.c.bf16 %v1031_v24, %v1030_v23  ;;  %v1156_v24 = vld [vmem:[#allocation6 + $0x460] sm:$0xff] }
 0x596   :  { %2212 = vmatpush3.bf16.msra.mxu0 %v2211_v41  ;;  %v917_v41 = vld [vmem:[#allocation6 + $0x368] sm:$0xff] }
 0x597   :  { %2213 = vmatprep.subr.bf16.mxu0 %v2480_v0  ;;  %v2244_v42 = vpack.c.bf16 %v917_v41, %v916_v40 }
 0x598   :  { %2230 = vmatpush3.bf16.msra.mxu1 %v2229_v27  ;;  %v1033_v27 = vld [vmem:[#allocation6 + $0x3c8] sm:$0xff] }
 0x599   :  { %2231 = vmatprep.subr.bf16.mxu1 %v2480_v0 }
 0x59a   :  { %2215 = vmatpush3.bf16.msra.mxu0 %v2214_v44  ;;  %v919_v44 = vld [vmem:[#allocation6 + $0x378] sm:$0xff] }
 0x59b   :  { %2216 = vmatprep.subr.bf16.mxu0 %v2480_v0  ;;  %v2247_v45 = vpack.c.bf16 %v919_v44, %v918_v43 }
 0x59e   :  { %2218 = vmatpush3.bf16.msra.mxu0 %v2217_v47 }
 0x59f   :  { %2219 = vmatprep.subr.bf16.mxu0 %v2480_v0 }
 0x5a2   :  { %2221 = vmatpush3.bf16.msra.mxu0 %v2220_v50 }
 0x5a3   :  { %2222 = vmatprep.subr.bf16.mxu0 %v2480_v0 }
 0x5a6   :  { %2224 = vmatpush3.bf16.msra.mxu0 %v2223_v53 }
 0x5a7   :  { %2249 = vmatprep.subr.bf16.mxu0 %v2480_v0 }
 0x666   :  { %v746_v54 = vpop.f32.mrb[4].mxu1 }
 0x667   :  { %v752_v57 = vrot.slane %v746_v54, 4  ;;  %v1864_v58 = vpop.f32.mrb[5].mxu1 }
 0x669   :  { %v753_v59 = vadd.f32 %v752_v57, %v746_v54 }
 0x66b   :  { %v754_v60 = vrot.slane %v753_v59, 2 }
 0x66d   :  { %v755_v61 = vadd.f32 %v754_v60, %v753_v59 }
 0x66f   :  { %v756_v62 = vrot.slane %v755_v61, 1 }
 0x671   :  { %v757_v63 = vadd.f32 %v756_v62, %v755_v61 }
 0x673   :  { %v758_v2 = vmul.f32 0.125, %v757_v63 }
 0x675   :  { %v759_v3 = vsub.f32 %v746_v54, %v758_v2 }
 0x677   :  { %v760_v4 = vmul.f32 %v759_v3, %v759_v3 }
 0x679   :  { %v761_v5 = vrot.slane %v760_v4, 4 }
 0x67b   :  { %v762_v6 = vadd.f32 %v761_v5, %v760_v4  ;;  %v871_v5 = vld [vmem:[#allocation7 + $0xc] sm:$0x3] }
 0x67d   :  { %v763_v7 = vrot.slane %v762_v6, 2 }
 0x67f   :  { %v764_v8 = vadd.f32 %v763_v7, %v762_v6 }
 0x681   :  { %v765_v9 = vrot.slane %v764_v8, 1 }
 0x683   :  { %v766_v10 = vadd.f32 %v765_v9, %v764_v8  ;;  %v899_v9 = vrot.slane %v871_v5, %v2587_v56 }
 0x685   :  { %v767_v11 = vmul.f32 0.125, %v766_v10 }
 0x687   :  { %v768_v12 = vadd.f32 1e-05, %v767_v11 }
 0x689   :  { %2366 = vrsqrt.f32 %v768_v12 }
 0x693   :  { %v2367_v14 = vpop.eup %2366 }
 0x694   :  { %v770_v15 = vmul.f32 %v2367_v14, %v751_v13  ;;  %v1024_v14 = vld [vmem:[#allocation6 + $0x380] sm:$0xff] }
 0x696   :  { %v774_v16 = vrot.slane %v770_v15, %v2585_v55  ;;  %v1025_v15 = vld [vmem:[#allocation6 + $0x388] sm:$0xff] }
 0x698   :  { %v775_v18 = vmul.f32 %v774_v16, %v759_v3  ;;  %v2250_v16 = vpack.c.bf16 %v1025_v15, %v1024_v14  ;;  %v1150_v15 = vld [vmem:[#allocation6 + $0x430] sm:$0xff] }
 0x69a   :  { %v780_v19 = vadd.f32 %v779_v17, %v775_v18  ;;  %v1026_v17 = vld [vmem:[#allocation6 + $0x390] sm:$0xff]  ;;  %v1027_v18 = vld [vmem:[#allocation6 + $0x398] sm:$0xff] }
 0x69c   :  { %v2686_v20 = vadd.f32 %v780_v19, %v662_v29  ;;  %v909_v29 = vld [vmem:[#allocation6 + $0x328] sm:$0xff]  ;;  %v2253_v19 = vpack.c.bf16 %v1027_v18, %v1026_v17  ;;  %v1152_v18 = vld [vmem:[#allocation6 + $0x440] sm:$0xff] }
 0x69d   :  { %v2232_v30 = vpack.c.bf16 %v909_v29, %v908_v28  ;;  %v2262_v28 = vpack.c.bf16 %v1033_v27, %v1032_v26  ;;  %v1034_v29 = vld [vmem:[#allocation6 + $0x3d0] sm:$0xff] }
 0x69e   :  { %v782_v21 = vmax.f32 %v2686_v20, 0.0  ;;  %v1028_v20 = vld [vmem:[#allocation6 + $0x3a0] sm:$0xff]  ;;  %v1158_v27 = vld [vmem:[#allocation6 + $0x470] sm:$0xff] }
 0x69f   :  { %2233 = vmatpush3.bf16.msra.mxu1 %v2232_v30  ;;  %v1035_v30 = vld [vmem:[#allocation6 + $0x3d8] sm:$0xff] }
 0x6a0   :  { %1898 = vmatmul.mubr.f32.vlgmr.msra.gmra.mrb[6].mxu0 %v782_v21  ;;  %2234 = vmatprep.subr.bf16.mxu1 %v2480_v0  ;;  %v2265_v31 = vpack.c.bf16 %v1035_v30, %v1034_v29 }
 0x6a1   :  { %1967 = vmatprep.mubr.msk.f32.mxu0 %vm2481_vm0, %v2482_v1  ;;  %2251 = vmatpush3.bf16.msra.mxu0 %v2250_v16  ;;  %v1151_v16 = vld [vmem:[#allocation6 + $0x438] sm:$0xff] }
 0x6a2   :  { %2252 = vmatprep.subr.bf16.mxu0 %v2480_v0  ;;  %v2283_v17 = vpack.c.bf16 %v1151_v16, %v1150_v15  ;;  %v1276_v15 = vld [vmem:[#allocation6 + $0x4e0] sm:$0xff]  ;;  %v1277_v16 = vld [vmem:[#allocation6 + $0x4e8] sm:$0xff] }
 0x6a3   :  { %2236 = vmatpush3.bf16.msra.mxu1 %v2235_v33  ;;  %v1037_v33 = vld [vmem:[#allocation6 + $0x3e8] sm:$0xff] }
 0x6a4   :  { %2237 = vmatprep.subr.bf16.mxu1 %v2480_v0  ;;  %v2268_v34 = vpack.c.bf16 %v1037_v33, %v1036_v32 }
 0x6a5   :  { %2254 = vmatpush3.bf16.msra.mxu0 %v2253_v19  ;;  %v1153_v19 = vld [vmem:[#allocation6 + $0x448] sm:$0xff] }
 0x6a6   :  { %2255 = vmatprep.subr.bf16.mxu0 %v2480_v0 }
 0x6a7   :  { %2239 = vmatpush3.bf16.msra.mxu1 %v2238_v36  ;;  %v1039_v36 = vld [vmem:[#allocation6 + $0x3f8] sm:$0xff] }
 0x6a8   :  { %2240 = vmatprep.subr.bf16.mxu1 %v2480_v0  ;;  %v2271_v37 = vpack.c.bf16 %v1039_v36, %v1038_v35 }
 0x6ab   :  { %2242 = vmatpush3.bf16.msra.mxu1 %v2241_v39 }
 0x6ac   :  { %2243 = vmatprep.subr.bf16.mxu1 %v2480_v0 }
 0x6af   :  { %2245 = vmatpush3.bf16.msra.mxu1 %v2244_v42 }
 0x6b0   :  { %2246 = vmatprep.subr.bf16.mxu1 %v2480_v0 }
 0x6b3   :  { %2248 = vmatpush3.bf16.msra.mxu1 %v2247_v45 }
 0x6b4   :  { %2273 = vmatprep.subr.bf16.mxu1 %v2480_v0 }
 0x773   :  { %v866_v46 = vpop.f32.mrb[6].mxu0 }
 0x774   :  { %v872_v47 = vrot.slane %v866_v46, 4  ;;  %v1899_v48 = vpop.f32.mrb[7].mxu0 }
 0x776   :  { %v873_v49 = vadd.f32 %v872_v47, %v866_v46 }
 0x778   :  { %v874_v50 = vrot.slane %v873_v49, 2 }
 0x77a   :  { %v875_v51 = vadd.f32 %v874_v50, %v873_v49 }
 0x77c   :  { %v876_v52 = vrot.slane %v875_v51, 1 }
 0x77e   :  { %v877_v53 = vadd.f32 %v876_v52, %v875_v51 }
 0x780   :  { %v878_v54 = vmul.f32 0.125, %v877_v53 }
 0x782   :  { %v879_v57 = vsub.f32 %v866_v46, %v878_v54 }
 0x784   :  { %v880_v58 = vmul.f32 %v879_v57, %v879_v57 }
 0x786   :  { %v881_v59 = vrot.slane %v880_v58, 4 }
 0x788   :  { %v882_v60 = vadd.f32 %v881_v59, %v880_v58  ;;  %v991_v59 = vld [vmem:[#allocation7 + $0xe] sm:$0x3] }
 0x78a   :  { %v883_v61 = vrot.slane %v882_v60, 2 }
 0x78c   :  { %v884_v62 = vadd.f32 %v883_v61, %v882_v60 }
 0x78e   :  { %v885_v63 = vrot.slane %v884_v62, 1 }
 0x790   :  { %v886_v2 = vadd.f32 %v885_v63, %v884_v62  ;;  %v1019_v63 = vrot.slane %v991_v59, %v2587_v56 }
 0x792   :  { %v887_v3 = vmul.f32 0.125, %v886_v2 }
 0x794   :  { %v888_v4 = vadd.f32 1e-05, %v887_v3 }
 0x796   :  { %2368 = vrsqrt.f32 %v888_v4 }
 0x7a0   :  { %v2369_v6 = vpop.eup %2368 }
 0x7a1   :  { %v890_v7 = vmul.f32 %v2369_v6, %v871_v5  ;;  %v1144_v6 = vld [vmem:[#allocation6 + $0x400] sm:$0xff] }
 0x7a3   :  { %v894_v8 = vrot.slane %v890_v7, %v2585_v55  ;;  %v1145_v7 = vld [vmem:[#allocation6 + $0x408] sm:$0xff] }
 0x7a5   :  { %v895_v10 = vmul.f32 %v894_v8, %v879_v57  ;;  %v2274_v8 = vpack.c.bf16 %v1145_v7, %v1144_v6  ;;  %v1270_v7 = vld [vmem:[#allocation6 + $0x4b0] sm:$0xff] }
 0x7a7   :  { %v900_v11 = vadd.f32 %v899_v9, %v895_v10  ;;  %v1146_v9 = vld [vmem:[#allocation6 + $0x410] sm:$0xff]  ;;  %v1147_v10 = vld [vmem:[#allocation6 + $0x418] sm:$0xff] }
 0x7a9   :  { %v2705_v12 = vadd.f32 %v900_v11, %v782_v21  ;;  %v1029_v21 = vld [vmem:[#allocation6 + $0x3a8] sm:$0xff]  ;;  %v2277_v11 = vpack.c.bf16 %v1147_v10, %v1146_v9  ;;  %v1272_v9 = vld [vmem:[#allocation6 + $0x4c0] sm:$0xff] }
 0x7aa   :  { %v2256_v22 = vpack.c.bf16 %v1029_v21, %v1028_v20  ;;  %v2286_v20 = vpack.c.bf16 %v1153_v19, %v1152_v18  ;;  %v1154_v21 = vld [vmem:[#allocation6 + $0x450] sm:$0xff]  ;;  %v1273_v10 = vld [vmem:[#allocation6 + $0x4c8] sm:$0xff]  ;;  %v1279_v19 = vld [vmem:[#allocation6 + $0x4f8] sm:$0xff] }
 0x7ab   :  { %v902_v13 = vmax.f32 %v2705_v12, 0.0  ;;  %v1148_v12 = vld [vmem:[#allocation6 + $0x420] sm:$0xff]  ;;  %v1278_v18 = vld [vmem:[#allocation6 + $0x4f0] sm:$0xff] }
 0x7ac   :  { %2257 = vmatpush3.bf16.msra.mxu0 %v2256_v22  ;;  %v1155_v22 = vld [vmem:[#allocation6 + $0x458] sm:$0xff] }
 0x7ad   :  { %1933 = vmatmul.mubr.f32.vlgmr.msra.gmra.mrb[6].mxu1 %v902_v13  ;;  %2258 = vmatprep.subr.bf16.mxu0 %v2480_v0  ;;  %v2289_v23 = vpack.c.bf16 %v1155_v22, %v1154_v21 }
 0x7ae   :  { %2002 = vmatprep.mubr.msk.f32.mxu1 %vm2481_vm0, %v2482_v1  ;;  %2275 = vmatpush3.bf16.msra.mxu1 %v2274_v8 }
 0x7af   :  { %2276 = vmatprep.subr.bf16.mxu1 %v2480_v0 }
 0x7b0   :  { %2260 = vmatpush3.bf16.msra.mxu0 %v2259_v25  ;;  %v1157_v25 = vld [vmem:[#allocation6 + $0x468] sm:$0xff] }
 0x7b1   :  { %2261 = vmatprep.subr.bf16.mxu0 %v2480_v0  ;;  %v2292_v26 = vpack.c.bf16 %v1157_v25, %v1156_v24 }
 0x7b2   :  { %2278 = vmatpush3.bf16.msra.mxu1 %v2277_v11  ;;  %v2310_v11 = vpack.c.bf16 %v1273_v10, %v1272_v9  ;;  %v1398_v9 = vld [vmem:[#allocation6 + $0x570] sm:$0xff]  ;;  %v1399_v10 = vld [vmem:[#allocation6 + $0x578] sm:$0xff] }
 0x7b3   :  { %2279 = vmatprep.subr.bf16.mxu1 %v2480_v0 }
 0x7b4   :  { %2263 = vmatpush3.bf16.msra.mxu0 %v2262_v28  ;;  %v1159_v28 = vld [vmem:[#allocation6 + $0x478] sm:$0xff] }
 0x7b5   :  { %2264 = vmatprep.subr.bf16.mxu0 %v2480_v0  ;;  %v2295_v29 = vpack.c.bf16 %v1159_v28, %v1158_v27 }
 0x7b8   :  { %2266 = vmatpush3.bf16.msra.mxu0 %v2265_v31 }
 0x7b9   :  { %2267 = vmatprep.subr.bf16.mxu0 %v2480_v0 }
 0x7bc   :  { %2269 = vmatpush3.bf16.msra.mxu0 %v2268_v34 }
 0x7bd   :  { %2270 = vmatprep.subr.bf16.mxu0 %v2480_v0 }
 0x7c0   :  { %2272 = vmatpush3.bf16.msra.mxu0 %v2271_v37 }
 0x7c1   :  { %2297 = vmatprep.subr.bf16.mxu0 %v2480_v0 }
 0x880   :  { %v986_v38 = vpop.f32.mrb[6].mxu1 }
 0x881   :  { %v992_v39 = vrot.slane %v986_v38, 4  ;;  %v1934_v40 = vpop.f32.mrb[7].mxu1 }
 0x883   :  { %v993_v41 = vadd.f32 %v992_v39, %v986_v38 }
 0x885   :  { %v994_v42 = vrot.slane %v993_v41, 2 }
 0x887   :  { %v995_v43 = vadd.f32 %v994_v42, %v993_v41 }
 0x889   :  { %v996_v44 = vrot.slane %v995_v43, 1 }
 0x88b   :  { %v997_v45 = vadd.f32 %v996_v44, %v995_v43 }
 0x88d   :  { %v998_v46 = vmul.f32 0.125, %v997_v45 }
 0x88f   :  { %v999_v47 = vsub.f32 %v986_v38, %v998_v46 }
 0x891   :  { %v1000_v48 = vmul.f32 %v999_v47, %v999_v47 }
 0x893   :  { %v1001_v49 = vrot.slane %v1000_v48, 4 }
 0x895   :  { %v1002_v50 = vadd.f32 %v1001_v49, %v1000_v48  ;;  %v1111_v49 = vld [vmem:[#allocation7 + $0x10] sm:$0x3] }
 0x897   :  { %v1003_v51 = vrot.slane %v1002_v50, 2 }
 0x899   :  { %v1004_v52 = vadd.f32 %v1003_v51, %v1002_v50 }
 0x89b   :  { %v1005_v53 = vrot.slane %v1004_v52, 1 }
 0x89d   :  { %v1006_v54 = vadd.f32 %v1005_v53, %v1004_v52  ;;  %v1139_v53 = vrot.slane %v1111_v49, %v2587_v56 }
 0x89f   :  { %v1007_v57 = vmul.f32 0.125, %v1006_v54 }
 0x8a1   :  { %v1008_v58 = vadd.f32 1e-05, %v1007_v57 }
 0x8a3   :  { %2370 = vrsqrt.f32 %v1008_v58 }
 0x8ad   :  { %v2371_v60 = vpop.eup %2370 }
 0x8ae   :  { %v1010_v61 = vmul.f32 %v2371_v60, %v991_v59  ;;  %v1264_v60 = vld [vmem:[#allocation6 + $0x480] sm:$0xff] }
 0x8b0   :  { %v1014_v62 = vrot.slane %v1010_v61, %v2585_v55  ;;  %v1265_v61 = vld [vmem:[#allocation6 + $0x488] sm:$0xff] }
 0x8b2   :  { %v1015_v2 = vmul.f32 %v1014_v62, %v999_v47  ;;  %v2298_v62 = vpack.c.bf16 %v1265_v61, %v1264_v60  ;;  %v1390_v60 = vld [vmem:[#allocation6 + $0x530] sm:$0xff]  ;;  %v1391_v61 = vld [vmem:[#allocation6 + $0x538] sm:$0xff] }
 0x8b4   :  { %v1020_v3 = vadd.f32 %v1019_v63, %v1015_v2  ;;  %v1266_v63 = vld [vmem:[#allocation6 + $0x490] sm:$0xff]  ;;  %v1267_v2 = vld [vmem:[#allocation6 + $0x498] sm:$0xff] }
 0x8b6   :  { %v2724_v4 = vadd.f32 %v1020_v3, %v902_v13  ;;  %v1149_v13 = vld [vmem:[#allocation6 + $0x428] sm:$0xff]  ;;  %v2301_v3 = vpack.c.bf16 %v1267_v2, %v1266_v63  ;;  %v1392_v63 = vld [vmem:[#allocation6 + $0x540] sm:$0xff] }
 0x8b7   :  { %v2280_v14 = vpack.c.bf16 %v1149_v13, %v1148_v12  ;;  %v1274_v12 = vld [vmem:[#allocation6 + $0x4d0] sm:$0xff]  ;;  %v1275_v13 = vld [vmem:[#allocation6 + $0x4d8] sm:$0xff]  ;;  %v1393_v2 = vld [vmem:[#allocation6 + $0x548] sm:$0xff] }
 0x8b8   :  { %v1022_v5 = vmax.f32 %v2724_v4, 0.0  ;;  %v1268_v4 = vld [vmem:[#allocation6 + $0x4a0] sm:$0xff] }
 0x8b9   :  { %2281 = vmatpush3.bf16.msra.mxu1 %v2280_v14  ;;  %v2313_v14 = vpack.c.bf16 %v1275_v13, %v1274_v12 }
 0x8ba   :  { %1968 = vmatmul.mubr.f32.vlgmr.msra.gmra.mrb[8].mxu0 %v1022_v5  ;;  %2282 = vmatprep.subr.bf16.mxu1 %v2480_v0 }
 0x8bb   :  { %2037 = vmatprep.mubr.msk.f32.mxu0 %vm2481_vm0, %v2482_v1  ;;  %2299 = vmatpush3.bf16.msra.mxu0 %v2298_v62  ;;  %v2331_v62 = vpack.c.bf16 %v1391_v61, %v1390_v60 }
 0x8bc   :  { %2300 = vmatprep.subr.bf16.mxu0 %v2480_v0 }
 0x8bd   :  { %2284 = vmatpush3.bf16.msra.mxu1 %v2283_v17  ;;  %v2316_v17 = vpack.c.bf16 %v1277_v16, %v1276_v15 }
 0x8be   :  { %2285 = vmatprep.subr.bf16.mxu1 %v2480_v0 }
 0x8bf   :  { %2302 = vmatpush3.bf16.msra.mxu0 %v2301_v3  ;;  %v2334_v3 = vpack.c.bf16 %v1393_v2, %v1392_v63 }
 0x8c0   :  { %2303 = vmatprep.subr.bf16.mxu0 %v2480_v0 }
 0x8c1   :  { %2287 = vmatpush3.bf16.msra.mxu1 %v2286_v20  ;;  %v2319_v20 = vpack.c.bf16 %v1279_v19, %v1278_v18 }
 0x8c2   :  { %2288 = vmatprep.subr.bf16.mxu1 %v2480_v0 }
 0x8c5   :  { %2290 = vmatpush3.bf16.msra.mxu1 %v2289_v23 }
 0x8c6   :  { %2291 = vmatprep.subr.bf16.mxu1 %v2480_v0 }
 0x8c9   :  { %2293 = vmatpush3.bf16.msra.mxu1 %v2292_v26 }
 0x8ca   :  { %2294 = vmatprep.subr.bf16.mxu1 %v2480_v0 }
 0x8cd   :  { %2296 = vmatpush3.bf16.msra.mxu1 %v2295_v29 }
 0x8ce   :  { %2321 = vmatprep.subr.bf16.mxu1 %v2480_v0 }
 0x98d   :  { %v1106_v30 = vpop.f32.mrb[8].mxu0 }
 0x98e   :  { %v1112_v31 = vrot.slane %v1106_v30, 4  ;;  %v1969_v32 = vpop.f32.mrb[9].mxu0 }
 0x990   :  { %v1113_v33 = vadd.f32 %v1112_v31, %v1106_v30 }
 0x992   :  { %v1114_v34 = vrot.slane %v1113_v33, 2 }
 0x994   :  { %v1115_v35 = vadd.f32 %v1114_v34, %v1113_v33 }
 0x996   :  { %v1116_v36 = vrot.slane %v1115_v35, 1 }
 0x998   :  { %v1117_v37 = vadd.f32 %v1116_v36, %v1115_v35 }
 0x99a   :  { %v1118_v38 = vmul.f32 0.125, %v1117_v37 }
 0x99c   :  { %v1119_v39 = vsub.f32 %v1106_v30, %v1118_v38 }
 0x99e   :  { %v1120_v40 = vmul.f32 %v1119_v39, %v1119_v39 }
 0x9a0   :  { %v1121_v41 = vrot.slane %v1120_v40, 4 }
 0x9a2   :  { %v1122_v42 = vadd.f32 %v1121_v41, %v1120_v40  ;;  %v1231_v40 = vld [vmem:[#allocation7 + $0x12] sm:$0x3] }
 0x9a4   :  { %v1123_v43 = vrot.slane %v1122_v42, 2 }
 0x9a6   :  { %v1124_v44 = vadd.f32 %v1123_v43, %v1122_v42 }
 0x9a8   :  { %v1125_v45 = vrot.slane %v1124_v44, 1 }
 0x9aa   :  { %v1126_v46 = vadd.f32 %v1125_v45, %v1124_v44  ;;  %v1259_v44 = vrot.slane %v1231_v40, %v2587_v56 }
 0x9ac   :  { %v1127_v47 = vmul.f32 0.125, %v1126_v46 }
 0x9ae   :  { %v1128_v48 = vadd.f32 1e-05, %v1127_v47 }
 0x9b0   :  { %2372 = vrsqrt.f32 %v1128_v48 }
 0x9ba   :  { %v2373_v50 = vpop.eup %2372 }
 0x9bb   :  { %v1130_v51 = vmul.f32 %v2373_v50, %v1111_v49  ;;  %v1384_v49 = vld [vmem:[#allocation6 + $0x500] sm:$0xff]  ;;  %v1385_v50 = vld [vmem:[#allocation6 + $0x508] sm:$0xff] }
 0x9bd   :  { %v1134_v52 = vrot.slane %v1130_v51, %v2585_v55  ;;  %v2322_v51 = vpack.c.bf16 %v1385_v50, %v1384_v49 }
 0x9bf   :  { %v1135_v54 = vmul.f32 %v1134_v52, %v1119_v39  ;;  %v1386_v52 = vld [vmem:[#allocation6 + $0x510] sm:$0xff] }
 0x9c1   :  { %v1140_v57 = vadd.f32 %v1139_v53, %v1135_v54  ;;  %v1387_v53 = vld [vmem:[#allocation6 + $0x518] sm:$0xff] }
 0x9c2   :  { %v2325_v54 = vpack.c.bf16 %v1387_v53, %v1386_v52 }
 0x9c3   :  { %v2743_v58 = vadd.f32 %v1140_v57, %v1022_v5  ;;  %v1269_v5 = vld [vmem:[#allocation6 + $0x4a8] sm:$0xff]  ;;  %v1388_v57 = vld [vmem:[#allocation6 + $0x520] sm:$0xff] }
 0x9c4   :  { %v2304_v6 = vpack.c.bf16 %v1269_v5, %v1268_v4  ;;  %v1394_v4 = vld [vmem:[#allocation6 + $0x550] sm:$0xff]  ;;  %v1395_v5 = vld [vmem:[#allocation6 + $0x558] sm:$0xff] }
 0x9c5   :  { %v1142_v59 = vmax.f32 %v2743_v58, 0.0  ;;  %v1389_v58 = vld [vmem:[#allocation6 + $0x528] sm:$0xff] }
 0x9c6   :  { %2305 = vmatpush3.bf16.msra.mxu0 %v2304_v6  ;;  %v2337_v6 = vpack.c.bf16 %v1395_v5, %v1394_v4 }
 0x9c7   :  { %2003 = vmatmul.mubr.f32.vlgmr.msra.gmra.mrb[8].mxu1 %v1142_v59  ;;  %2306 = vmatprep.subr.bf16.mxu0 %v2480_v0 }
 0x9c8   :  { %2072 = vmatprep.mubr.msk.f32.mxu1 %vm2481_vm0, %v2482_v1  ;;  %v1271_v1 = vld [vmem:[#allocation6 + $0x4b8] sm:$0xff]  ;;  %2323 = vmatpush3.bf16.msra.mxu1 %v2322_v51 }
 0x9c9   :  { %v2307_v8 = vpack.c.bf16 %v1271_v1, %v1270_v7  ;;  %2324 = vmatprep.subr.bf16.mxu1 %v2480_v0  ;;  %v1396_v7 = vld [vmem:[#allocation6 + $0x560] sm:$0xff]  ;;  %v1397_v1 = vld [vmem:[#allocation6 + $0x568] sm:$0xff] }
 0x9cb   :  { %2308 = vmatpush3.bf16.msra.mxu0 %v2307_v8  ;;  %v2340_v8 = vpack.c.bf16 %v1397_v1, %v1396_v7 }
 0x9cc   :  { %2309 = vmatprep.subr.bf16.mxu0 %v2480_v0  ;;  %2326 = vmatpush3.bf16.msra.mxu1 %v2325_v54 }
 0x9cd   :  { %2327 = vmatprep.subr.bf16.mxu1 %v2480_v0 }
 0x9cf   :  { %2311 = vmatpush3.bf16.msra.mxu0 %v2310_v11  ;;  %v2343_v11 = vpack.c.bf16 %v1399_v10, %v1398_v9 }
 0x9d0   :  { %2312 = vmatprep.subr.bf16.mxu0 %v2480_v0 }
 0x9d3   :  { %2314 = vmatpush3.bf16.msra.mxu0 %v2313_v14 }
 0x9d4   :  { %2315 = vmatprep.subr.bf16.mxu0 %v2480_v0 }
 0x9d7   :  { %2317 = vmatpush3.bf16.msra.mxu0 %v2316_v17 }
 0x9d8   :  { %2318 = vmatprep.subr.bf16.mxu0 %v2480_v0 }
 0x9db   :  { %2320 = vmatpush3.bf16.msra.mxu0 %v2319_v20 }
 0xa9a   :  { %v1226_v21 = vpop.f32.mrb[8].mxu1 }
 0xa9b   :  { %v1232_v22 = vrot.slane %v1226_v21, 4  ;;  %v2004_v23 = vpop.f32.mrb[9].mxu1 }
 0xa9d   :  { %v1233_v24 = vadd.f32 %v1232_v22, %v1226_v21 }
 0xa9f   :  { %v1234_v25 = vrot.slane %v1233_v24, 2 }
 0xaa1   :  { %v1235_v26 = vadd.f32 %v1234_v25, %v1233_v24 }
 0xaa3   :  { %v1236_v27 = vrot.slane %v1235_v26, 1 }
 0xaa5   :  { %v1237_v28 = vadd.f32 %v1236_v27, %v1235_v26 }
 0xaa7   :  { %v1238_v29 = vmul.f32 0.125, %v1237_v28 }
 0xaa9   :  { %v1239_v30 = vsub.f32 %v1226_v21, %v1238_v29 }
 0xaab   :  { %v1240_v31 = vmul.f32 %v1239_v30, %v1239_v30 }
 0xaad   :  { %v1241_v32 = vrot.slane %v1240_v31, 4 }
 0xaaf   :  { %v1242_v33 = vadd.f32 %v1241_v32, %v1240_v31 }
 0xab1   :  { %v1243_v34 = vrot.slane %v1242_v33, 2 }
 0xab3   :  { %v1244_v35 = vadd.f32 %v1243_v34, %v1242_v33 }
 0xab5   :  { %v1245_v36 = vrot.slane %v1244_v35, 1 }
 0xab7   :  { %v1246_v37 = vadd.f32 %v1245_v36, %v1244_v35 }
 0xab9   :  { %v1247_v38 = vmul.f32 0.125, %v1246_v37 }
 0xabb   :  { %v1248_v39 = vadd.f32 1e-05, %v1247_v38 }
 0xabd   :  { %2374 = vrsqrt.f32 %v1248_v39  ;;  %v1486_v39 = vld [vmem:[%s2787_s4] ss:$0 sm:$0xff] }
 0xac7   :  { %v2375_v41 = vpop.eup %2374 }
 0xac8   :  { %v1250_v42 = vmul.f32 %v2375_v41, %v1231_v40 }
 0xaca   :  { %v1254_v43 = vrot.slane %v1250_v42, %v2585_v55 }
 0xacc   :  { %v1255_v45 = vmul.f32 %v1254_v43, %v1239_v30  ;;  %v1351_v30 = vld [vmem:[#allocation7 + $0x14] sm:$0x3] }
 0xacd   :  { %v1379_v34 = vrot.slane %v1351_v30, %v2587_v56 }
 0xace   :  { %v1260_v46 = vadd.f32 %v1259_v44, %v1255_v45 }
 0xad0   :  { %v2761_v47 = vadd.f32 %v1260_v46, %v1142_v59  ;;  %v2328_v59 = vpack.c.bf16 %v1389_v58, %v1388_v57 }
 0xad2   :  { %v1262_v48 = vmax.f32 %v2761_v47, 0.0  ;;  %2329 = vmatpush3.bf16.msra.mxu1 %v2328_v59 }
 0xad3   :  { %2330 = vmatprep.subr.bf16.mxu1 %v2480_v0 }
 0xad4   :  { %2038 = vmatmul.mubr.f32.vlgmr.msra.gmra.mrb[10].mxu0 %v1262_v48 }
 0xad6   :  { %2332 = vmatpush3.bf16.msra.mxu1 %v2331_v62 }
 0xad7   :  { %2333 = vmatprep.subr.bf16.mxu1 %v2480_v0 }
 0xada   :  { %2335 = vmatpush3.bf16.msra.mxu1 %v2334_v3 }
 0xadb   :  { %2336 = vmatprep.subr.bf16.mxu1 %v2480_v0 }
 0xade   :  { %2338 = vmatpush3.bf16.msra.mxu1 %v2337_v6 }
 0xadf   :  { %2339 = vmatprep.subr.bf16.mxu1 %v2480_v0 }
 0xae2   :  { %2341 = vmatpush3.bf16.msra.mxu1 %v2340_v8 }
 0xae3   :  { %2342 = vmatprep.subr.bf16.mxu1 %v2480_v0 }
 0xae6   :  { %2344 = vmatpush3.bf16.msra.mxu1 %v2343_v11 }
 0xba7   :  { %v1346_v12 = vpop.f32.mrb[10].mxu0 }
 0xba8   :  { %v1352_v13 = vrot.slane %v1346_v12, 4  ;;  %v2039_v14 = vpop.f32.mrb[11].mxu0 }
 0xbaa   :  { %v1353_v15 = vadd.f32 %v1352_v13, %v1346_v12 }
 0xbac   :  { %v1354_v16 = vrot.slane %v1353_v15, 2 }
 0xbae   :  { %v1355_v17 = vadd.f32 %v1354_v16, %v1353_v15 }
 0xbb0   :  { %v1356_v18 = vrot.slane %v1355_v17, 1 }
 0xbb2   :  { %v1357_v19 = vadd.f32 %v1356_v18, %v1355_v17 }
 0xbb4   :  { %v1358_v20 = vmul.f32 0.125, %v1357_v19 }
 0xbb6   :  { %v1359_v21 = vsub.f32 %v1346_v12, %v1358_v20 }
 0xbb8   :  { %v1360_v22 = vmul.f32 %v1359_v21, %v1359_v21 }
 0xbba   :  { %v1361_v23 = vrot.slane %v1360_v22, 4 }
 0xbbc   :  { %v1362_v24 = vadd.f32 %v1361_v23, %v1360_v22 }
 0xbbe   :  { %v1363_v25 = vrot.slane %v1362_v24, 2 }
 0xbc0   :  { %v1364_v26 = vadd.f32 %v1363_v25, %v1362_v24 }
 0xbc2   :  { %v1365_v0 = vrot.slane %v1364_v26, 1 }
 0xbc4   :  { %v1366_v27 = vadd.f32 %v1365_v0, %v1364_v26 }
 0xbc6   :  { %v1367_v28 = vmul.f32 0.125, %v1366_v27 }
 0xbc8   :  { %v1368_v29 = vadd.f32 1e-05, %v1367_v28 }
 0xbca   :  { %2376 = vrsqrt.f32 %v1368_v29 }
 0xbd4   :  { %v2377_v31 = vpop.eup %2376 }
 0xbd5   :  { %v1370_v32 = vmul.f32 %v2377_v31, %v1351_v30 }
 0xbd7   :  { %v1374_v33 = vrot.slane %v1370_v32, %v2585_v55 }
 0xbd9   :  { %v1375_v35 = vmul.f32 %v1374_v33, %v1359_v21 }
 0xbdb   :  { %v1380_v36 = vadd.f32 %v1379_v34, %v1375_v35 }
 0xbdd   :  { %v1381_v37 = vadd.f32 %v1380_v36, %v1262_v48 }
 0xbdf   :  { %v1382_v38 = vmax.f32 %v1381_v37, 0.0 }
 0xbe1   :  { %2073 = vmatmul.mubr.f32.vlgmr.msra.gmra.mrb[10].mxu1 %v1382_v38 }
 0xcb4   :  { %v1473_v40 = vpop.f32.mrb[10].mxu1 }
 0xcb5   :  { %v1474_v41 = vadd.f32 %v1486_v39, %v1473_v40  ;;  %v2074_v42 = vpop.f32.mrb[11].mxu1 }
 0xcb7   :  { %1477 = vst [vmem:[%s2788_s5] sm:$0xff] %v1474_v41 }
 0xcb8   :  { %1482 = vsyncpa [#allocation3], 1 }
 0xcb9   :  { %1483 = vsyncpa [#allocation5], 1 }
 0xcba   :  { %1484 = vsyncpa [#allocation8], 1 }

</bundles_post_ra>
